<compile_context>
chip_gen: v6e
topology: v6e:2x2x1
jax: 0.10.0
libtpu: 0.0.40
codegen_flags: <defaults>
</compile_context>

<pallas_src>
import math
import jax
import jax.numpy as jnp
from jax import lax
from jax.experimental import pallas as pl
from jax.experimental.pallas import tpu as pltpu

# ----------------------------- model config ---------------------------------
VOCAB_SIZE = 64
EMBED_SIZE = 32
NUM_MHA    = 2
NUM_HEADS  = 4
FF_SIZE    = 64
HEAD_DIM   = EMBED_SIZE // NUM_HEADS
LN_EPS     = 1e-5
VOCAB_PAD  = 128          # lane-dense output width (multiple of 128)

SLAB_W              = 128   # lane width of the packed f32 parameter slab
SLAB_ROWS_PER_LAYER = 8     # bqkv, bo, ln1w, ln1b, b1, b2, ln2w, ln2b

BATCH = 2
SEQ   = 8


# ----------------------------- kernel helpers -------------------------------
def _layer_norm(x, w, b):
    # x: (N, E) f32; w, b: (1, E) f32  -- stats kept in f32 (v5e has no bf16 VPU/EUP)
    mu  = jnp.mean(x, axis=-1, keepdims=True)
    var = jnp.mean((x - mu) ** 2, axis=-1, keepdims=True)
    return (x - mu) * lax.rsqrt(var + LN_EPS) * w + b


# ------------------------- fused forward kernel ------------------------------
def fused_forward_kernel(tok_ref, emb_ref, mask_ref, wqkv_ref, wo_ref,
                         w1_ref, w2_ref, linw_ref, fslab_ref,
                         out_ref, x_scratch):
    N  = x_scratch.shape[0]          # B*S rows folded onto sublanes
    E  = EMBED_SIZE
    H  = NUM_HEADS
    Dh = HEAD_DIM

    # --- embedding lookup: tokens in SMEM drive dynamic VMEM row reads -------
    for i in range(N):               # static unroll (N = 16)
        x_scratch[pl.ds(i, 1), :] = emb_ref[pl.ds(tok_ref[i], 1), :]
    x = x_scratch[...]                                    # (N, E) f32

    mask_bias = mask_ref[...]                             # (H*N, H*N) f32 additive mask
    fslab     = fslab_ref[...]                            # (L*8+1, 128) f32 param slab

    for l in range(NUM_MHA):                              # static unroll over layers
        base = l * SLAB_ROWS_PER_LAYER
        bqkv = fslab[base + 0:base + 1, :3 * E]           # (1, 96)
        bo   = fslab[base + 1:base + 2, :E]
        ln1w = fslab[base + 2:base + 3, :E]
        ln1b = fslab[base + 3:base + 4, :E]
        b1   = fslab[base + 4:base + 5, :FF_SIZE]
        b2   = fslab[base + 5:base + 6, :E]
        ln2w = fslab[base + 6:base + 7, :E]
        ln2b = fslab[base + 7:base + 8, :E]

        xb = x.astype(jnp.bfloat16)

        # --- fused Q/K/V projection: one MXU push (scale folded into W_q/b_q) ---
        qkv = jnp.dot(xb, wqkv_ref[l],
                      preferred_element_type=jnp.float32) + bqkv       # (N, 3E)

        # --- pack heads onto the sublane axis: (N, 3E) -> three (H*N, Dh) ---
        q_p = jnp.concatenate([qkv[:,           h * Dh:          (h + 1) * Dh]
                               for h in range(H)], axis=0)             # (H*N, Dh)
        k_p = jnp.concatenate([qkv[:,     E +   h * Dh:     E + (h + 1) * Dh]
                               for h in range(H)], axis=0)
        v_p = jnp.concatenate([qkv[:, 2 * E +   h * Dh: 2 * E + (h + 1) * Dh]
                               for h in range(H)], axis=0)

        # --- all heads' scores in ONE matmul, ONE softmax ---------------------
        s = lax.dot_general(q_p.astype(jnp.bfloat16), k_p.astype(jnp.bfloat16),
                            dimension_numbers=(((1,), (1,)), ((), ())),
                            preferred_element_type=jnp.float32)        # (H*N, H*N)
        s = s + mask_bias                  # blocks cross-head / cross-batch / future
        s = s - jnp.max(s, axis=-1, keepdims=True)
        p = jnp.exp(s)
        p = p * pl.reciprocal(jnp.sum(p, axis=-1, keepdims=True), approx=True)

        ctx_p = jnp.dot(p.astype(jnp.bfloat16), v_p.astype(jnp.bfloat16),
                        preferred_element_type=jnp.float32)            # (H*N, Dh)

        # --- unpack heads back to lanes (== concat(heads)); one W_o matmul ----
        ctx = jnp.concatenate([ctx_p[h * N:(h + 1) * N, :] for h in range(H)],
                              axis=1)                                  # (N, E)
        attn = jnp.dot(ctx.astype(jnp.bfloat16), wo_ref[l],
                       preferred_element_type=jnp.float32) + bo        # (N, E)

        x = _layer_norm(x + attn, ln1w, ln1b)

        # --- feed-forward (ReLU), post-LN -------------------------------------
        xb = x.astype(jnp.bfloat16)
        h1 = jnp.maximum(
            jnp.dot(xb, w1_ref[l], preferred_element_type=jnp.float32) + b1, 0.0)
        ff = jnp.dot(h1.astype(jnp.bfloat16), w2_ref[l],
                     preferred_element_type=jnp.float32) + b2

        x = _layer_norm(x + ff, ln2w, ln2b)

    # --- final vocab projection (lane-dense, padded to 128) -------------------
    lb_row = NUM_MHA * SLAB_ROWS_PER_LAYER
    lin_b  = fslab[lb_row:lb_row + 1, :]                               # (1, 128)
    logits = jnp.dot(x.astype(jnp.bfloat16), linw_ref[...],
                     preferred_element_type=jnp.float32) + lin_b
    out_ref[...] = logits.astype(out_ref.dtype)


# ----------------------------- parameter init --------------------------------
def init_params(key):
    """Parameters in the natural (PyTorch-like) layout."""
    std = 0.02
    keys = iter(jax.random.split(key, 4 + NUM_MHA * 8))

    params = {}
    params["embedding"] = jax.random.normal(next(keys), (VOCAB_SIZE, EMBED_SIZE),
                                            jnp.float32) * std
    layers = []
    for _ in range(NUM_MHA):
        E, F = EMBED_SIZE, FF_SIZE
        layers.append({
            "wq": jax.random.normal(next(keys), (E, E), jnp.float32) * std,
            "bq": jnp.zeros((1, E), jnp.float32),
            "wk": jax.random.normal(next(keys), (E, E), jnp.float32) * std,
            "bk": jnp.zeros((1, E), jnp.float32),
            "wv": jax.random.normal(next(keys), (E, E), jnp.float32) * std,
            "bv": jnp.zeros((1, E), jnp.float32),
            "wo": jax.random.normal(next(keys), (E, E), jnp.float32) * std,
            "bo": jnp.zeros((1, E), jnp.float32),
            "ln1_w": jnp.ones((1, E), jnp.float32),
            "ln1_b": jnp.zeros((1, E), jnp.float32),
            "w1": jax.random.normal(next(keys), (E, F), jnp.float32) * std,
            "b1": jnp.zeros((1, F), jnp.float32),
            "w2": jax.random.normal(next(keys), (F, E), jnp.float32) * std,
            "b2": jnp.zeros((1, E), jnp.float32),
            "ln2_w": jnp.ones((1, E), jnp.float32),
            "ln2_b": jnp.zeros((1, E), jnp.float32),
        })
    params["layers"] = layers
    params["lin_w"] = jax.random.normal(next(keys), (EMBED_SIZE, VOCAB_SIZE),
                                        jnp.float32) * std
    params["lin_b"] = jnp.zeros((1, VOCAB_SIZE), jnp.float32)
    return params


def prep_params(params, batch, seq):
    """Host-side prep (done once): fuse QKV weights, fold softmax scale, bf16-cast
    matmul weights, pack all tiny f32 params into one slab, pad the vocab projection
    to a lane-dense 128 width, and precompute the packed-heads additive mask."""
    E, H, Dh = EMBED_SIZE, NUM_HEADS, HEAD_DIM
    scale = 1.0 / math.sqrt(Dh)

    wqkv = jnp.stack([jnp.concatenate([lp["wq"] * scale, lp["wk"], lp["wv"]], axis=1)
                      for lp in params["layers"]]).astype(jnp.bfloat16)   # (L, E, 3E)
    wo = jnp.stack([lp["wo"] for lp in params["layers"]]).astype(jnp.bfloat16)
    w1 = jnp.stack([lp["w1"] for lp in params["layers"]]).astype(jnp.bfloat16)
    w2 = jnp.stack([lp["w2"] for lp in params["layers"]]).astype(jnp.bfloat16)

    lin_w = jnp.zeros((E, VOCAB_PAD), jnp.float32)
    lin_w = lin_w.at[:, :VOCAB_SIZE].set(params["lin_w"]).astype(jnp.bfloat16)

    def row(v):
        v = jnp.asarray(v, jnp.float32).reshape(1, -1)
        return jnp.zeros((1, SLAB_W), jnp.float32).at[:, :v.shape[1]].set(v)

    rows = []
    for lp in params["layers"]:
        bqkv = jnp.concatenate([lp["bq"] * scale, lp["bk"], lp["bv"]], axis=1)
        rows += [row(bqkv), row(lp["bo"]), row(lp["ln1_w"]), row(lp["ln1_b"]),
                 row(lp["b1"]), row(lp["b2"]), row(lp["ln2_w"]), row(lp["ln2_b"])]
    rows.append(row(params["lin_b"]))
    fslab = jnp.concatenate(rows, axis=0)            # (L*8 + 1, 128) f32

    # additive mask for heads packed on the sublane axis: row r = h*N + (b*S + t)
    # attends column c = h'*N + (b'*S + t') iff h==h' and b==b' and t' <= t.
    N = batch * seq
    r = jnp.arange(H * N)
    head = r // N
    b_ix = (r % N) // seq
    t_ix = (r % N) % seq
    allowed = ((head[:, None] == head[None, :]) &
               (b_ix[:, None] == b_ix[None, :]) &
               (t_ix[None, :] <= t_ix[:, None]))
    mask = jnp.where(allowed, 0.0, -1e30).astype(jnp.float32)   # (H*N, H*N)

    return {"embedding": params["embedding"].astype(jnp.float32),
            "wqkv": wqkv, "wo": wo, "w1": w1, "w2": w2,
            "lin_w": lin_w, "fslab": fslab, "mask": mask}


# ------------------------------- forward -------------------------------------
def testllm_forward(tokens, p):
    B, S = tokens.shape
    N = B * S
    tok_flat = tokens.reshape(N).astype(jnp.int32)

    vmem = pl.BlockSpec(memory_space=pltpu.MemorySpace.VMEM)
    smem = pl.BlockSpec(memory_space=pltpu.MemorySpace.SMEM)

    out = pl.pallas_call(
        fused_forward_kernel,
        out_shape=jax.ShapeDtypeStruct((N, VOCAB_PAD), jnp.float32),
        in_specs=[smem,            # tokens (scalars)
                  vmem,            # embedding table
                  vmem,            # packed-heads additive mask
                  vmem, vmem,      # wqkv, wo
                  vmem, vmem,      # w1, w2
                  vmem,            # lin_w (padded)
                  vmem],           # f32 param slab
        out_specs=vmem,
        scratch_shapes=[pltpu.VMEM((N, EMBED_SIZE), jnp.float32)],
    )(tok_flat, p["embedding"], p["mask"], p["wqkv"], p["wo"],
      p["w1"], p["w2"], p["lin_w"], p["fslab"])

    # TODO(synk): key_padding_mask (the `mask` argument of the PyTorch forward) is not
    # supported; only the mask=None path is implemented.
    # TODO(synk): torch.isnan(...).any() + raise is a host-side runtime assertion with
    # no clean in-graph Pallas equivalent; it is checked outside (see __main__).
    return out.reshape(B, S, VOCAB_PAD)[:, :, :VOCAB_SIZE]


# --------------------------------- main ---------------------------------------
if __name__ == "__main__":
    key = jax.random.PRNGKey(0)
    pkey, tkey = jax.random.split(key)
    params = init_params(pkey)
    prepped = prep_params(params, BATCH, SEQ)
    tokens = jax.random.randint(tkey, (BATCH, SEQ), 0, VOCAB_SIZE, dtype=jnp.int32)

    logits = jax.jit(testllm_forward)(tokens, prepped)
    jax.block_until_ready(logits)
    assert logits.shape == (BATCH, SEQ, VOCAB_SIZE)
    assert not bool(jnp.isnan(logits).any())
    print("KERNEL_OK")
</pallas_src>

<mosaic_0001>
module attributes {stable_mosaic.version = 11 : i64} {
  func.func @fused_forward_kernel(%arg0: memref<16xi32, #tpu.memory_space<smem>>, %arg1: memref<64x32xf32, #tpu.memory_space<vmem>>, %arg2: memref<64x64xf32, #tpu.memory_space<vmem>>, %arg3: memref<2x32x96xbf16, #tpu.memory_space<vmem>>, %arg4: memref<2x32x32xbf16, #tpu.memory_space<vmem>>, %arg5: memref<2x32x64xbf16, #tpu.memory_space<vmem>>, %arg6: memref<2x64x32xbf16, #tpu.memory_space<vmem>>, %arg7: memref<32x128xbf16, #tpu.memory_space<vmem>>, %arg8: memref<17x128xf32, #tpu.memory_space<vmem>>, %arg9: memref<16x128xf32, #tpu.memory_space<vmem>>, %arg10: memref<16x32xf32, #tpu.memory_space<vmem>>) attributes {dimension_semantics = [], scalar_prefetch = 0 : i64, scratch_operands = 1 : i64, tpu.core_type = #tpu.core_type<tc>} {
    %c0 = arith.constant 0 : index
    %0 = memref.load %arg0[%c0] : memref<16xi32, #tpu.memory_space<smem>>
    %1 = arith.index_cast %0 : i32 to index
    %c0_0 = arith.constant 0 : index
    %2 = vector.load %arg1[%1, %c0_0] : memref<64x32xf32, #tpu.memory_space<vmem>>, vector<1x32xf32>
    %c0_1 = arith.constant 0 : index
    %c0_2 = arith.constant 0 : index
    %3 = vector.load %arg10[%c0_1, %c0_2] : memref<16x32xf32, #tpu.memory_space<vmem>>, vector<1x32xf32>
    tpu.vector_store %arg10[%c0_1, %c0_2], %2 {strides = array<i32>} : memref<16x32xf32, #tpu.memory_space<vmem>>, vector<1x32xf32>,
    %c1 = arith.constant 1 : index
    %4 = memref.load %arg0[%c1] : memref<16xi32, #tpu.memory_space<smem>>
    %5 = arith.index_cast %4 : i32 to index
    %c0_3 = arith.constant 0 : index
    %6 = vector.load %arg1[%5, %c0_3] : memref<64x32xf32, #tpu.memory_space<vmem>>, vector<1x32xf32>
    %c1_4 = arith.constant 1 : index
    %c0_5 = arith.constant 0 : index
    %7 = vector.load %arg10[%c1_4, %c0_5] : memref<16x32xf32, #tpu.memory_space<vmem>>, vector<1x32xf32>
    tpu.vector_store %arg10[%c1_4, %c0_5], %6 {strides = array<i32>} : memref<16x32xf32, #tpu.memory_space<vmem>>, vector<1x32xf32>,
    %c2 = arith.constant 2 : index
    %8 = memref.load %arg0[%c2] : memref<16xi32, #tpu.memory_space<smem>>
    %9 = arith.index_cast %8 : i32 to index
    %c0_6 = arith.constant 0 : index
    %10 = vector.load %arg1[%9, %c0_6] : memref<64x32xf32, #tpu.memory_space<vmem>>, vector<1x32xf32>
    %c2_7 = arith.constant 2 : index
    %c0_8 = arith.constant 0 : index
    %11 = vector.load %arg10[%c2_7, %c0_8] : memref<16x32xf32, #tpu.memory_space<vmem>>, vector<1x32xf32>
    tpu.vector_store %arg10[%c2_7, %c0_8], %10 {strides = array<i32>} : memref<16x32xf32, #tpu.memory_space<vmem>>, vector<1x32xf32>,
    %c3 = arith.constant 3 : index
    %12 = memref.load %arg0[%c3] : memref<16xi32, #tpu.memory_space<smem>>
    %13 = arith.index_cast %12 : i32 to index
    %c0_9 = arith.constant 0 : index
    %14 = vector.load %arg1[%13, %c0_9] : memref<64x32xf32, #tpu.memory_space<vmem>>, vector<1x32xf32>
    %c3_10 = arith.constant 3 : index
    %c0_11 = arith.constant 0 : index
    %15 = vector.load %arg10[%c3_10, %c0_11] : memref<16x32xf32, #tpu.memory_space<vmem>>, vector<1x32xf32>
    tpu.vector_store %arg10[%c3_10, %c0_11], %14 {strides = array<i32>} : memref<16x32xf32, #tpu.memory_space<vmem>>, vector<1x32xf32>,
    %c4 = arith.constant 4 : index
    %16 = memref.load %arg0[%c4] : memref<16xi32, #tpu.memory_space<smem>>
    %17 = arith.index_cast %16 : i32 to index
    %c0_12 = arith.constant 0 : index
    %18 = vector.load %arg1[%17, %c0_12] : memref<64x32xf32, #tpu.memory_space<vmem>>, vector<1x32xf32>
    %c4_13 = arith.constant 4 : index
    %c0_14 = arith.constant 0 : index
    %19 = vector.load %arg10[%c4_13, %c0_14] : memref<16x32xf32, #tpu.memory_space<vmem>>, vector<1x32xf32>
    tpu.vector_store %arg10[%c4_13, %c0_14], %18 {strides = array<i32>} : memref<16x32xf32, #tpu.memory_space<vmem>>, vector<1x32xf32>,
    %c5 = arith.constant 5 : index
    %20 = memref.load %arg0[%c5] : memref<16xi32, #tpu.memory_space<smem>>
    %21 = arith.index_cast %20 : i32 to index
    %c0_15 = arith.constant 0 : index
    %22 = vector.load %arg1[%21, %c0_15] : memref<64x32xf32, #tpu.memory_space<vmem>>, vector<1x32xf32>
    %c5_16 = arith.constant 5 : index
    %c0_17 = arith.constant 0 : index
    %23 = vector.load %arg10[%c5_16, %c0_17] : memref<16x32xf32, #tpu.memory_space<vmem>>, vector<1x32xf32>
    tpu.vector_store %arg10[%c5_16, %c0_17], %22 {strides = array<i32>} : memref<16x32xf32, #tpu.memory_space<vmem>>, vector<1x32xf32>,
    %c6 = arith.constant 6 : index
    %24 = memref.load %arg0[%c6] : memref<16xi32, #tpu.memory_space<smem>>
    %25 = arith.index_cast %24 : i32 to index
    %c0_18 = arith.constant 0 : index
    %26 = vector.load %arg1[%25, %c0_18] : memref<64x32xf32, #tpu.memory_space<vmem>>, vector<1x32xf32>
    %c6_19 = arith.constant 6 : index
    %c0_20 = arith.constant 0 : index
    %27 = vector.load %arg10[%c6_19, %c0_20] : memref<16x32xf32, #tpu.memory_space<vmem>>, vector<1x32xf32>
    tpu.vector_store %arg10[%c6_19, %c0_20], %26 {strides = array<i32>} : memref<16x32xf32, #tpu.memory_space<vmem>>, vector<1x32xf32>,
    %c7 = arith.constant 7 : index
    %28 = memref.load %arg0[%c7] : memref<16xi32, #tpu.memory_space<smem>>
    %29 = arith.index_cast %28 : i32 to index
    %c0_21 = arith.constant 0 : index
    %30 = vector.load %arg1[%29, %c0_21] : memref<64x32xf32, #tpu.memory_space<vmem>>, vector<1x32xf32>
    %c7_22 = arith.constant 7 : index
    %c0_23 = arith.constant 0 : index
    %31 = vector.load %arg10[%c7_22, %c0_23] : memref<16x32xf32, #tpu.memory_space<vmem>>, vector<1x32xf32>
    tpu.vector_store %arg10[%c7_22, %c0_23], %30 {strides = array<i32>} : memref<16x32xf32, #tpu.memory_space<vmem>>, vector<1x32xf32>,
    %c8 = arith.constant 8 : index
    %32 = memref.load %arg0[%c8] : memref<16xi32, #tpu.memory_space<smem>>
    %33 = arith.index_cast %32 : i32 to index
    %c0_24 = arith.constant 0 : index
    %34 = vector.load %arg1[%33, %c0_24] : memref<64x32xf32, #tpu.memory_space<vmem>>, vector<1x32xf32>
    %c8_25 = arith.constant 8 : index
    %c0_26 = arith.constant 0 : index
    %35 = vector.load %arg10[%c8_25, %c0_26] : memref<16x32xf32, #tpu.memory_space<vmem>>, vector<1x32xf32>
    tpu.vector_store %arg10[%c8_25, %c0_26], %34 {strides = array<i32>} : memref<16x32xf32, #tpu.memory_space<vmem>>, vector<1x32xf32>,
    %c9 = arith.constant 9 : index
    %36 = memref.load %arg0[%c9] : memref<16xi32, #tpu.memory_space<smem>>
    %37 = arith.index_cast %36 : i32 to index
    %c0_27 = arith.constant 0 : index
    %38 = vector.load %arg1[%37, %c0_27] : memref<64x32xf32, #tpu.memory_space<vmem>>, vector<1x32xf32>
    %c9_28 = arith.constant 9 : index
    %c0_29 = arith.constant 0 : index
    %39 = vector.load %arg10[%c9_28, %c0_29] : memref<16x32xf32, #tpu.memory_space<vmem>>, vector<1x32xf32>
    tpu.vector_store %arg10[%c9_28, %c0_29], %38 {strides = array<i32>} : memref<16x32xf32, #tpu.memory_space<vmem>>, vector<1x32xf32>,
    %c10 = arith.constant 10 : index
    %40 = memref.load %arg0[%c10] : memref<16xi32, #tpu.memory_space<smem>>
    %41 = arith.index_cast %40 : i32 to index
    %c0_30 = arith.constant 0 : index
    %42 = vector.load %arg1[%41, %c0_30] : memref<64x32xf32, #tpu.memory_space<vmem>>, vector<1x32xf32>
    %c10_31 = arith.constant 10 : index
    %c0_32 = arith.constant 0 : index
    %43 = vector.load %arg10[%c10_31, %c0_32] : memref<16x32xf32, #tpu.memory_space<vmem>>, vector<1x32xf32>
    tpu.vector_store %arg10[%c10_31, %c0_32], %42 {strides = array<i32>} : memref<16x32xf32, #tpu.memory_space<vmem>>, vector<1x32xf32>,
    %c11 = arith.constant 11 : index
    %44 = memref.load %arg0[%c11] : memref<16xi32, #tpu.memory_space<smem>>
    %45 = arith.index_cast %44 : i32 to index
    %c0_33 = arith.constant 0 : index
    %46 = vector.load %arg1[%45, %c0_33] : memref<64x32xf32, #tpu.memory_space<vmem>>, vector<1x32xf32>
    %c11_34 = arith.constant 11 : index
    %c0_35 = arith.constant 0 : index
    %47 = vector.load %arg10[%c11_34, %c0_35] : memref<16x32xf32, #tpu.memory_space<vmem>>, vector<1x32xf32>
    tpu.vector_store %arg10[%c11_34, %c0_35], %46 {strides = array<i32>} : memref<16x32xf32, #tpu.memory_space<vmem>>, vector<1x32xf32>,
    %c12 = arith.constant 12 : index
    %48 = memref.load %arg0[%c12] : memref<16xi32, #tpu.memory_space<smem>>
    %49 = arith.index_cast %48 : i32 to index
    %c0_36 = arith.constant 0 : index
    %50 = vector.load %arg1[%49, %c0_36] : memref<64x32xf32, #tpu.memory_space<vmem>>, vector<1x32xf32>
    %c12_37 = arith.constant 12 : index
    %c0_38 = arith.constant 0 : index
    %51 = vector.load %arg10[%c12_37, %c0_38] : memref<16x32xf32, #tpu.memory_space<vmem>>, vector<1x32xf32>
    tpu.vector_store %arg10[%c12_37, %c0_38], %50 {strides = array<i32>} : memref<16x32xf32, #tpu.memory_space<vmem>>, vector<1x32xf32>,
    %c13 = arith.constant 13 : index
    %52 = memref.load %arg0[%c13] : memref<16xi32, #tpu.memory_space<smem>>
    %53 = arith.index_cast %52 : i32 to index
    %c0_39 = arith.constant 0 : index
    %54 = vector.load %arg1[%53, %c0_39] : memref<64x32xf32, #tpu.memory_space<vmem>>, vector<1x32xf32>
    %c13_40 = arith.constant 13 : index
    %c0_41 = arith.constant 0 : index
    %55 = vector.load %arg10[%c13_40, %c0_41] : memref<16x32xf32, #tpu.memory_space<vmem>>, vector<1x32xf32>
    tpu.vector_store %arg10[%c13_40, %c0_41], %54 {strides = array<i32>} : memref<16x32xf32, #tpu.memory_space<vmem>>, vector<1x32xf32>,
    %c14 = arith.constant 14 : index
    %56 = memref.load %arg0[%c14] : memref<16xi32, #tpu.memory_space<smem>>
    %57 = arith.index_cast %56 : i32 to index
    %c0_42 = arith.constant 0 : index
    %58 = vector.load %arg1[%57, %c0_42] : memref<64x32xf32, #tpu.memory_space<vmem>>, vector<1x32xf32>
    %c14_43 = arith.constant 14 : index
    %c0_44 = arith.constant 0 : index
    %59 = vector.load %arg10[%c14_43, %c0_44] : memref<16x32xf32, #tpu.memory_space<vmem>>, vector<1x32xf32>
    tpu.vector_store %arg10[%c14_43, %c0_44], %58 {strides = array<i32>} : memref<16x32xf32, #tpu.memory_space<vmem>>, vector<1x32xf32>,
    %c15 = arith.constant 15 : index
    %60 = memref.load %arg0[%c15] : memref<16xi32, #tpu.memory_space<smem>>
    %61 = arith.index_cast %60 : i32 to index
    %c0_45 = arith.constant 0 : index
    %62 = vector.load %arg1[%61, %c0_45] : memref<64x32xf32, #tpu.memory_space<vmem>>, vector<1x32xf32>
    %c15_46 = arith.constant 15 : index
    %c0_47 = arith.constant 0 : index
    %63 = vector.load %arg10[%c15_46, %c0_47] : memref<16x32xf32, #tpu.memory_space<vmem>>, vector<1x32xf32>
    tpu.vector_store %arg10[%c15_46, %c0_47], %62 {strides = array<i32>} : memref<16x32xf32, #tpu.memory_space<vmem>>, vector<1x32xf32>,
    %c0_48 = arith.constant 0 : index
    %c0_49 = arith.constant 0 : index
    %64 = vector.load %arg10[%c0_48, %c0_49] : memref<16x32xf32, #tpu.memory_space<vmem>>, vector<16x32xf32>
    %c0_50 = arith.constant 0 : index
    %c0_51 = arith.constant 0 : index
    %65 = vector.load %arg2[%c0_50, %c0_51] : memref<64x64xf32, #tpu.memory_space<vmem>>, vector<64x64xf32>
    %c0_52 = arith.constant 0 : index
    %c0_53 = arith.constant 0 : index
    %66 = vector.load %arg8[%c0_52, %c0_53] : memref<17x128xf32, #tpu.memory_space<vmem>>, vector<17x128xf32>
    %67 = vector.extract_strided_slice %66 {offsets = [0, 0], sizes = [1, 96], strides = [1, 1]} : vector<17x128xf32> to vector<1x96xf32>
    %68 = vector.extract_strided_slice %66 {offsets = [1, 0], sizes = [1, 32], strides = [1, 1]} : vector<17x128xf32> to vector<1x32xf32>
    %69 = vector.extract_strided_slice %66 {offsets = [2, 0], sizes = [1, 32], strides = [1, 1]} : vector<17x128xf32> to vector<1x32xf32>
    %70 = vector.extract_strided_slice %66 {offsets = [3, 0], sizes = [1, 32], strides = [1, 1]} : vector<17x128xf32> to vector<1x32xf32>
    %71 = vector.extract_strided_slice %66 {offsets = [4, 0], sizes = [1, 64], strides = [1, 1]} : vector<17x128xf32> to vector<1x64xf32>
    %72 = vector.extract_strided_slice %66 {offsets = [5, 0], sizes = [1, 32], strides = [1, 1]} : vector<17x128xf32> to vector<1x32xf32>
    %73 = vector.extract_strided_slice %66 {offsets = [6, 0], sizes = [1, 32], strides = [1, 1]} : vector<17x128xf32> to vector<1x32xf32>
    %74 = vector.extract_strided_slice %66 {offsets = [7, 0], sizes = [1, 32], strides = [1, 1]} : vector<17x128xf32> to vector<1x32xf32>
    %75 = arith.truncf %64 : vector<16x32xf32> to vector<16x32xbf16>
    %c0_54 = arith.constant 0 : index
    %c0_55 = arith.constant 0 : index
    %c0_56 = arith.constant 0 : index
    %76 = vector.load %arg3[%c0_54, %c0_55, %c0_56] : memref<2x32x96xbf16, #tpu.memory_space<vmem>>, vector<1x32x96xbf16>
    %77 = vector.shape_cast %76 : vector<1x32x96xbf16> to vector<32x96xbf16>
    %cst = arith.constant dense<0.000000e+00> : vector<16x96xf32>
    %78 = tpu.matmul %75, %77, %cst {dimension_numbers = #tpu.dot_dimension_numbers<[1], [0], [0], [1], [0, 0, 1, 1], [], []>} : vector<16x32xbf16>, vector<32x96xbf16>, vector<16x96xf32> -> vector<16x96xf32>
    %79 = vector.broadcast %67 : vector<1x96xf32> to vector<16x96xf32>
    %80 = arith.addf %78, %79 : vector<16x96xf32>
    %81 = vector.extract_strided_slice %80 {offsets = [0, 0], sizes = [16, 8], strides = [1, 1]} : vector<16x96xf32> to vector<16x8xf32>
    %82 = vector.extract_strided_slice %80 {offsets = [0, 8], sizes = [16, 8], strides = [1, 1]} : vector<16x96xf32> to vector<16x8xf32>
    %83 = vector.extract_strided_slice %80 {offsets = [0, 16], sizes = [16, 8], strides = [1, 1]} : vector<16x96xf32> to vector<16x8xf32>
    %84 = vector.extract_strided_slice %80 {offsets = [0, 24], sizes = [16, 8], strides = [1, 1]} : vector<16x96xf32> to vector<16x8xf32>
    %85 = tpu.concatenate %81, %82, %83, %84 in 0 : vector<16x8xf32>, vector<16x8xf32>, vector<16x8xf32>, vector<16x8xf32> -> vector<64x8xf32>
    %86 = vector.extract_strided_slice %80 {offsets = [0, 32], sizes = [16, 8], strides = [1, 1]} : vector<16x96xf32> to vector<16x8xf32>
    %87 = vector.extract_strided_slice %80 {offsets = [0, 40], sizes = [16, 8], strides = [1, 1]} : vector<16x96xf32> to vector<16x8xf32>
    %88 = vector.extract_strided_slice %80 {offsets = [0, 48], sizes = [16, 8], strides = [1, 1]} : vector<16x96xf32> to vector<16x8xf32>
    %89 = vector.extract_strided_slice %80 {offsets = [0, 56], sizes = [16, 8], strides = [1, 1]} : vector<16x96xf32> to vector<16x8xf32>
    %90 = tpu.concatenate %86, %87, %88, %89 in 0 : vector<16x8xf32>, vector<16x8xf32>, vector<16x8xf32>, vector<16x8xf32> -> vector<64x8xf32>
    %91 = vector.extract_strided_slice %80 {offsets = [0, 64], sizes = [16, 8], strides = [1, 1]} : vector<16x96xf32> to vector<16x8xf32>
    %92 = vector.extract_strided_slice %80 {offsets = [0, 72], sizes = [16, 8], strides = [1, 1]} : vector<16x96xf32> to vector<16x8xf32>
    %93 = vector.extract_strided_slice %80 {offsets = [0, 80], sizes = [16, 8], strides = [1, 1]} : vector<16x96xf32> to vector<16x8xf32>
    %94 = vector.extract_strided_slice %80 {offsets = [0, 88], sizes = [16, 8], strides = [1, 1]} : vector<16x96xf32> to vector<16x8xf32>
    %95 = tpu.concatenate %91, %92, %93, %94 in 0 : vector<16x8xf32>, vector<16x8xf32>, vector<16x8xf32>, vector<16x8xf32> -> vector<64x8xf32>
    %96 = arith.truncf %85 : vector<64x8xf32> to vector<64x8xbf16>
    %97 = arith.truncf %90 : vector<64x8xf32> to vector<64x8xbf16>
    %cst_57 = arith.constant dense<0.000000e+00> : vector<64x64xf32>
    %98 = tpu.matmul %96, %97, %cst_57 {dimension_numbers = #tpu.dot_dimension_numbers<[1], [1], [0], [0], [0, 0, 1, 0], [], []>} : vector<64x8xbf16>, vector<64x8xbf16>, vector<64x64xf32> -> vector<64x64xf32>
    %99 = arith.addf %98, %65 : vector<64x64xf32>
    %cst_58 = arith.constant dense<0xFF800000> : vector<64xf32>
    %100 = vector.multi_reduction <maximumf>, %99, %cst_58 [1] : vector<64x64xf32> to vector<64xf32>
    %101 = vector.shape_cast %100 : vector<64xf32> to vector<64x1xf32>
    %102 = vector.broadcast %101 : vector<64x1xf32> to vector<64x64xf32>
    %103 = arith.subf %99, %102 : vector<64x64xf32>
    %104 = math.exp %103 : vector<64x64xf32>
    %cst_59 = arith.constant dense<0.000000e+00> : vector<64xf32>
    %105 = vector.multi_reduction <add>, %104, %cst_59 [1] : vector<64x64xf32> to vector<64xf32>
    %106 = vector.shape_cast %105 : vector<64xf32> to vector<64x1xf32>
    %107 = tpu.reciprocal %106 {approx = true} : vector<64x1xf32> -> vector<64x1xf32>
    %108 = vector.broadcast %107 : vector<64x1xf32> to vector<64x64xf32>
    %109 = arith.mulf %104, %108 : vector<64x64xf32>
    %110 = arith.truncf %109 : vector<64x64xf32> to vector<64x64xbf16>
    %111 = arith.truncf %95 : vector<64x8xf32> to vector<64x8xbf16>
    %cst_60 = arith.constant dense<0.000000e+00> : vector<64x8xf32>
    %112 = tpu.matmul %110, %111, %cst_60 {dimension_numbers = #tpu.dot_dimension_numbers<[1], [0], [0], [1], [0, 0, 1, 1], [], []>} : vector<64x64xbf16>, vector<64x8xbf16>, vector<64x8xf32> -> vector<64x8xf32>
    %113 = vector.extract_strided_slice %112 {offsets = [0, 0], sizes = [16, 8], strides = [1, 1]} : vector<64x8xf32> to vector<16x8xf32>
    %114 = vector.extract_strided_slice %112 {offsets = [16, 0], sizes = [16, 8], strides = [1, 1]} : vector<64x8xf32> to vector<16x8xf32>
    %115 = vector.extract_strided_slice %112 {offsets = [32, 0], sizes = [16, 8], strides = [1, 1]} : vector<64x8xf32> to vector<16x8xf32>
    %116 = vector.extract_strided_slice %112 {offsets = [48, 0], sizes = [16, 8], strides = [1, 1]} : vector<64x8xf32> to vector<16x8xf32>
    %117 = tpu.concatenate %113, %114, %115, %116 in 1 : vector<16x8xf32>, vector<16x8xf32>, vector<16x8xf32>, vector<16x8xf32> -> vector<16x32xf32>
    %118 = arith.truncf %117 : vector<16x32xf32> to vector<16x32xbf16>
    %c0_61 = arith.constant 0 : index
    %c0_62 = arith.constant 0 : index
    %c0_63 = arith.constant 0 : index
    %119 = vector.load %arg4[%c0_61, %c0_62, %c0_63] : memref<2x32x32xbf16, #tpu.memory_space<vmem>>, vector<1x32x32xbf16>
    %120 = vector.shape_cast %119 : vector<1x32x32xbf16> to vector<32x32xbf16>
    %cst_64 = arith.constant dense<0.000000e+00> : vector<16x32xf32>
    %121 = tpu.matmul %118, %120, %cst_64 {dimension_numbers = #tpu.dot_dimension_numbers<[1], [0], [0], [1], [0, 0, 1, 1], [], []>} : vector<16x32xbf16>, vector<32x32xbf16>, vector<16x32xf32> -> vector<16x32xf32>
    %122 = vector.broadcast %68 : vector<1x32xf32> to vector<16x32xf32>
    %123 = arith.addf %121, %122 : vector<16x32xf32>
    %124 = arith.addf %64, %123 : vector<16x32xf32>
    %cst_65 = arith.constant dense<0.000000e+00> : vector<16xf32>
    %125 = vector.multi_reduction <add>, %124, %cst_65 [1] : vector<16x32xf32> to vector<16xf32>
    %126 = vector.shape_cast %125 : vector<16xf32> to vector<16x1xf32>
    %cst_66 = arith.constant 3.200000e+01 : f32
    %127 = vector.broadcast %cst_66 : f32 to vector<16x1xf32>
    %128 = arith.divf %126, %127 : vector<16x1xf32>
    %129 = vector.broadcast %128 : vector<16x1xf32> to vector<16x32xf32>
    %130 = arith.subf %124, %129 : vector<16x32xf32>
    %131 = arith.mulf %130, %130 : vector<16x32xf32>
    %cst_67 = arith.constant dense<0.000000e+00> : vector<16xf32>
    %132 = vector.multi_reduction <add>, %131, %cst_67 [1] : vector<16x32xf32> to vector<16xf32>
    %133 = vector.shape_cast %132 : vector<16xf32> to vector<16x1xf32>
    %cst_68 = arith.constant 3.200000e+01 : f32
    %134 = vector.broadcast %cst_68 : f32 to vector<16x1xf32>
    %135 = arith.divf %133, %134 : vector<16x1xf32>
    %136 = vector.broadcast %128 : vector<16x1xf32> to vector<16x32xf32>
    %137 = arith.subf %124, %136 : vector<16x32xf32>
    %cst_69 = arith.constant 9.99999974E-6 : f32
    %138 = vector.broadcast %cst_69 : f32 to vector<16x1xf32>
    %139 = arith.addf %135, %138 : vector<16x1xf32>
    %140 = math.rsqrt %139 : vector<16x1xf32>
    %141 = vector.broadcast %140 : vector<16x1xf32> to vector<16x32xf32>
    %142 = arith.mulf %137, %141 : vector<16x32xf32>
    %143 = vector.broadcast %69 : vector<1x32xf32> to vector<16x32xf32>
    %144 = arith.mulf %142, %143 : vector<16x32xf32>
    %145 = vector.broadcast %70 : vector<1x32xf32> to vector<16x32xf32>
    %146 = arith.addf %144, %145 : vector<16x32xf32>
    %147 = arith.truncf %146 : vector<16x32xf32> to vector<16x32xbf16>
    %c0_70 = arith.constant 0 : index
    %c0_71 = arith.constant 0 : index
    %c0_72 = arith.constant 0 : index
    %148 = vector.load %arg5[%c0_70, %c0_71, %c0_72] : memref<2x32x64xbf16, #tpu.memory_space<vmem>>, vector<1x32x64xbf16>
    %149 = vector.shape_cast %148 : vector<1x32x64xbf16> to vector<32x64xbf16>
    %cst_73 = arith.constant dense<0.000000e+00> : vector<16x64xf32>
    %150 = tpu.matmul %147, %149, %cst_73 {dimension_numbers = #tpu.dot_dimension_numbers<[1], [0], [0], [1], [0, 0, 1, 1], [], []>} : vector<16x32xbf16>, vector<32x64xbf16>, vector<16x64xf32> -> vector<16x64xf32>
    %151 = vector.broadcast %71 : vector<1x64xf32> to vector<16x64xf32>
    %152 = arith.addf %150, %151 : vector<16x64xf32>
    %cst_74 = arith.constant 0.000000e+00 : f32
    %153 = vector.broadcast %cst_74 : f32 to vector<16x64xf32>
    %154 = arith.maximumf %152, %153 : vector<16x64xf32>
    %155 = arith.truncf %154 : vector<16x64xf32> to vector<16x64xbf16>
    %c0_75 = arith.constant 0 : index
    %c0_76 = arith.constant 0 : index
    %c0_77 = arith.constant 0 : index
    %156 = vector.load %arg6[%c0_75, %c0_76, %c0_77] : memref<2x64x32xbf16, #tpu.memory_space<vmem>>, vector<1x64x32xbf16>
    %157 = vector.shape_cast %156 : vector<1x64x32xbf16> to vector<64x32xbf16>
    %cst_78 = arith.constant dense<0.000000e+00> : vector<16x32xf32>
    %158 = tpu.matmul %155, %157, %cst_78 {dimension_numbers = #tpu.dot_dimension_numbers<[1], [0], [0], [1], [0, 0, 1, 1], [], []>} : vector<16x64xbf16>, vector<64x32xbf16>, vector<16x32xf32> -> vector<16x32xf32>
    %159 = vector.broadcast %72 : vector<1x32xf32> to vector<16x32xf32>
    %160 = arith.addf %158, %159 : vector<16x32xf32>
    %161 = arith.addf %146, %160 : vector<16x32xf32>
    %cst_79 = arith.constant dense<0.000000e+00> : vector<16xf32>
    %162 = vector.multi_reduction <add>, %161, %cst_79 [1] : vector<16x32xf32> to vector<16xf32>
    %163 = vector.shape_cast %162 : vector<16xf32> to vector<16x1xf32>
    %cst_80 = arith.constant 3.200000e+01 : f32
    %164 = vector.broadcast %cst_80 : f32 to vector<16x1xf32>
    %165 = arith.divf %163, %164 : vector<16x1xf32>
    %166 = vector.broadcast %165 : vector<16x1xf32> to vector<16x32xf32>
    %167 = arith.subf %161, %166 : vector<16x32xf32>
    %168 = arith.mulf %167, %167 : vector<16x32xf32>
    %cst_81 = arith.constant dense<0.000000e+00> : vector<16xf32>
    %169 = vector.multi_reduction <add>, %168, %cst_81 [1] : vector<16x32xf32> to vector<16xf32>
    %170 = vector.shape_cast %169 : vector<16xf32> to vector<16x1xf32>
    %cst_82 = arith.constant 3.200000e+01 : f32
    %171 = vector.broadcast %cst_82 : f32 to vector<16x1xf32>
    %172 = arith.divf %170, %171 : vector<16x1xf32>
    %173 = vector.broadcast %165 : vector<16x1xf32> to vector<16x32xf32>
    %174 = arith.subf %161, %173 : vector<16x32xf32>
    %cst_83 = arith.constant 9.99999974E-6 : f32
    %175 = vector.broadcast %cst_83 : f32 to vector<16x1xf32>
    %176 = arith.addf %172, %175 : vector<16x1xf32>
    %177 = math.rsqrt %176 : vector<16x1xf32>
    %178 = vector.broadcast %177 : vector<16x1xf32> to vector<16x32xf32>
    %179 = arith.mulf %174, %178 : vector<16x32xf32>
    %180 = vector.broadcast %73 : vector<1x32xf32> to vector<16x32xf32>
    %181 = arith.mulf %179, %180 : vector<16x32xf32>
    %182 = vector.broadcast %74 : vector<1x32xf32> to vector<16x32xf32>
    %183 = arith.addf %181, %182 : vector<16x32xf32>
    %184 = vector.extract_strided_slice %66 {offsets = [8, 0], sizes = [1, 96], strides = [1, 1]} : vector<17x128xf32> to vector<1x96xf32>
    %185 = vector.extract_strided_slice %66 {offsets = [9, 0], sizes = [1, 32], strides = [1, 1]} : vector<17x128xf32> to vector<1x32xf32>
    %186 = vector.extract_strided_slice %66 {offsets = [10, 0], sizes = [1, 32], strides = [1, 1]} : vector<17x128xf32> to vector<1x32xf32>
    %187 = vector.extract_strided_slice %66 {offsets = [11, 0], sizes = [1, 32], strides = [1, 1]} : vector<17x128xf32> to vector<1x32xf32>
    %188 = vector.extract_strided_slice %66 {offsets = [12, 0], sizes = [1, 64], strides = [1, 1]} : vector<17x128xf32> to vector<1x64xf32>
    %189 = vector.extract_strided_slice %66 {offsets = [13, 0], sizes = [1, 32], strides = [1, 1]} : vector<17x128xf32> to vector<1x32xf32>
    %190 = vector.extract_strided_slice %66 {offsets = [14, 0], sizes = [1, 32], strides = [1, 1]} : vector<17x128xf32> to vector<1x32xf32>
    %191 = vector.extract_strided_slice %66 {offsets = [15, 0], sizes = [1, 32], strides = [1, 1]} : vector<17x128xf32> to vector<1x32xf32>
    %192 = arith.truncf %183 : vector<16x32xf32> to vector<16x32xbf16>
    %c1_84 = arith.constant 1 : index
    %c0_85 = arith.constant 0 : index
    %c0_86 = arith.constant 0 : index
    %193 = vector.load %arg3[%c1_84, %c0_85, %c0_86] : memref<2x32x96xbf16, #tpu.memory_space<vmem>>, vector<1x32x96xbf16>
    %194 = vector.shape_cast %193 : vector<1x32x96xbf16> to vector<32x96xbf16>
    %cst_87 = arith.constant dense<0.000000e+00> : vector<16x96xf32>
    %195 = tpu.matmul %192, %194, %cst_87 {dimension_numbers = #tpu.dot_dimension_numbers<[1], [0], [0], [1], [0, 0, 1, 1], [], []>} : vector<16x32xbf16>, vector<32x96xbf16>, vector<16x96xf32> -> vector<16x96xf32>
    %196 = vector.broadcast %184 : vector<1x96xf32> to vector<16x96xf32>
    %197 = arith.addf %195, %196 : vector<16x96xf32>
    %198 = vector.extract_strided_slice %197 {offsets = [0, 0], sizes = [16, 8], strides = [1, 1]} : vector<16x96xf32> to vector<16x8xf32>
    %199 = vector.extract_strided_slice %197 {offsets = [0, 8], sizes = [16, 8], strides = [1, 1]} : vector<16x96xf32> to vector<16x8xf32>
    %200 = vector.extract_strided_slice %197 {offsets = [0, 16], sizes = [16, 8], strides = [1, 1]} : vector<16x96xf32> to vector<16x8xf32>
    %201 = vector.extract_strided_slice %197 {offsets = [0, 24], sizes = [16, 8], strides = [1, 1]} : vector<16x96xf32> to vector<16x8xf32>
    %202 = tpu.concatenate %198, %199, %200, %201 in 0 : vector<16x8xf32>, vector<16x8xf32>, vector<16x8xf32>, vector<16x8xf32> -> vector<64x8xf32>
    %203 = vector.extract_strided_slice %197 {offsets = [0, 32], sizes = [16, 8], strides = [1, 1]} : vector<16x96xf32> to vector<16x8xf32>
    %204 = vector.extract_strided_slice %197 {offsets = [0, 40], sizes = [16, 8], strides = [1, 1]} : vector<16x96xf32> to vector<16x8xf32>
    %205 = vector.extract_strided_slice %197 {offsets = [0, 48], sizes = [16, 8], strides = [1, 1]} : vector<16x96xf32> to vector<16x8xf32>
    %206 = vector.extract_strided_slice %197 {offsets = [0, 56], sizes = [16, 8], strides = [1, 1]} : vector<16x96xf32> to vector<16x8xf32>
    %207 = tpu.concatenate %203, %204, %205, %206 in 0 : vector<16x8xf32>, vector<16x8xf32>, vector<16x8xf32>, vector<16x8xf32> -> vector<64x8xf32>
    %208 = vector.extract_strided_slice %197 {offsets = [0, 64], sizes = [16, 8], strides = [1, 1]} : vector<16x96xf32> to vector<16x8xf32>
    %209 = vector.extract_strided_slice %197 {offsets = [0, 72], sizes = [16, 8], strides = [1, 1]} : vector<16x96xf32> to vector<16x8xf32>
    %210 = vector.extract_strided_slice %197 {offsets = [0, 80], sizes = [16, 8], strides = [1, 1]} : vector<16x96xf32> to vector<16x8xf32>
    %211 = vector.extract_strided_slice %197 {offsets = [0, 88], sizes = [16, 8], strides = [1, 1]} : vector<16x96xf32> to vector<16x8xf32>
    %212 = tpu.concatenate %208, %209, %210, %211 in 0 : vector<16x8xf32>, vector<16x8xf32>, vector<16x8xf32>, vector<16x8xf32> -> vector<64x8xf32>
    %213 = arith.truncf %202 : vector<64x8xf32> to vector<64x8xbf16>
    %214 = arith.truncf %207 : vector<64x8xf32> to vector<64x8xbf16>
    %cst_88 = arith.constant dense<0.000000e+00> : vector<64x64xf32>
    %215 = tpu.matmul %213, %214, %cst_88 {dimension_numbers = #tpu.dot_dimension_numbers<[1], [1], [0], [0], [0, 0, 1, 0], [], []>} : vector<64x8xbf16>, vector<64x8xbf16>, vector<64x64xf32> -> vector<64x64xf32>
    %216 = arith.addf %215, %65 : vector<64x64xf32>
    %cst_89 = arith.constant dense<0xFF800000> : vector<64xf32>
    %217 = vector.multi_reduction <maximumf>, %216, %cst_89 [1] : vector<64x64xf32> to vector<64xf32>
    %218 = vector.shape_cast %217 : vector<64xf32> to vector<64x1xf32>
    %219 = vector.broadcast %218 : vector<64x1xf32> to vector<64x64xf32>
    %220 = arith.subf %216, %219 : vector<64x64xf32>
    %221 = math.exp %220 : vector<64x64xf32>
    %cst_90 = arith.constant dense<0.000000e+00> : vector<64xf32>
    %222 = vector.multi_reduction <add>, %221, %cst_90 [1] : vector<64x64xf32> to vector<64xf32>
    %223 = vector.shape_cast %222 : vector<64xf32> to vector<64x1xf32>
    %224 = tpu.reciprocal %223 {approx = true} : vector<64x1xf32> -> vector<64x1xf32>
    %225 = vector.broadcast %224 : vector<64x1xf32> to vector<64x64xf32>
    %226 = arith.mulf %221, %225 : vector<64x64xf32>
    %227 = arith.truncf %226 : vector<64x64xf32> to vector<64x64xbf16>
    %228 = arith.truncf %212 : vector<64x8xf32> to vector<64x8xbf16>
    %cst_91 = arith.constant dense<0.000000e+00> : vector<64x8xf32>
    %229 = tpu.matmul %227, %228, %cst_91 {dimension_numbers = #tpu.dot_dimension_numbers<[1], [0], [0], [1], [0, 0, 1, 1], [], []>} : vector<64x64xbf16>, vector<64x8xbf16>, vector<64x8xf32> -> vector<64x8xf32>
    %230 = vector.extract_strided_slice %229 {offsets = [0, 0], sizes = [16, 8], strides = [1, 1]} : vector<64x8xf32> to vector<16x8xf32>
    %231 = vector.extract_strided_slice %229 {offsets = [16, 0], sizes = [16, 8], strides = [1, 1]} : vector<64x8xf32> to vector<16x8xf32>
    %232 = vector.extract_strided_slice %229 {offsets = [32, 0], sizes = [16, 8], strides = [1, 1]} : vector<64x8xf32> to vector<16x8xf32>
    %233 = vector.extract_strided_slice %229 {offsets = [48, 0], sizes = [16, 8], strides = [1, 1]} : vector<64x8xf32> to vector<16x8xf32>
    %234 = tpu.concatenate %230, %231, %232, %233 in 1 : vector<16x8xf32>, vector<16x8xf32>, vector<16x8xf32>, vector<16x8xf32> -> vector<16x32xf32>
    %235 = arith.truncf %234 : vector<16x32xf32> to vector<16x32xbf16>
    %c1_92 = arith.constant 1 : index
    %c0_93 = arith.constant 0 : index
    %c0_94 = arith.constant 0 : index
    %236 = vector.load %arg4[%c1_92, %c0_93, %c0_94] : memref<2x32x32xbf16, #tpu.memory_space<vmem>>, vector<1x32x32xbf16>
    %237 = vector.shape_cast %236 : vector<1x32x32xbf16> to vector<32x32xbf16>
    %cst_95 = arith.constant dense<0.000000e+00> : vector<16x32xf32>
    %238 = tpu.matmul %235, %237, %cst_95 {dimension_numbers = #tpu.dot_dimension_numbers<[1], [0], [0], [1], [0, 0, 1, 1], [], []>} : vector<16x32xbf16>, vector<32x32xbf16>, vector<16x32xf32> -> vector<16x32xf32>
    %239 = vector.broadcast %185 : vector<1x32xf32> to vector<16x32xf32>
    %240 = arith.addf %238, %239 : vector<16x32xf32>
    %241 = arith.addf %183, %240 : vector<16x32xf32>
    %cst_96 = arith.constant dense<0.000000e+00> : vector<16xf32>
    %242 = vector.multi_reduction <add>, %241, %cst_96 [1] : vector<16x32xf32> to vector<16xf32>
    %243 = vector.shape_cast %242 : vector<16xf32> to vector<16x1xf32>
    %cst_97 = arith.constant 3.200000e+01 : f32
    %244 = vector.broadcast %cst_97 : f32 to vector<16x1xf32>
    %245 = arith.divf %243, %244 : vector<16x1xf32>
    %246 = vector.broadcast %245 : vector<16x1xf32> to vector<16x32xf32>
    %247 = arith.subf %241, %246 : vector<16x32xf32>
    %248 = arith.mulf %247, %247 : vector<16x32xf32>
    %cst_98 = arith.constant dense<0.000000e+00> : vector<16xf32>
    %249 = vector.multi_reduction <add>, %248, %cst_98 [1] : vector<16x32xf32> to vector<16xf32>
    %250 = vector.shape_cast %249 : vector<16xf32> to vector<16x1xf32>
    %cst_99 = arith.constant 3.200000e+01 : f32
    %251 = vector.broadcast %cst_99 : f32 to vector<16x1xf32>
    %252 = arith.divf %250, %251 : vector<16x1xf32>
    %253 = vector.broadcast %245 : vector<16x1xf32> to vector<16x32xf32>
    %254 = arith.subf %241, %253 : vector<16x32xf32>
    %cst_100 = arith.constant 9.99999974E-6 : f32
    %255 = vector.broadcast %cst_100 : f32 to vector<16x1xf32>
    %256 = arith.addf %252, %255 : vector<16x1xf32>
    %257 = math.rsqrt %256 : vector<16x1xf32>
    %258 = vector.broadcast %257 : vector<16x1xf32> to vector<16x32xf32>
    %259 = arith.mulf %254, %258 : vector<16x32xf32>
    %260 = vector.broadcast %186 : vector<1x32xf32> to vector<16x32xf32>
    %261 = arith.mulf %259, %260 : vector<16x32xf32>
    %262 = vector.broadcast %187 : vector<1x32xf32> to vector<16x32xf32>
    %263 = arith.addf %261, %262 : vector<16x32xf32>
    %264 = arith.truncf %263 : vector<16x32xf32> to vector<16x32xbf16>
    %c1_101 = arith.constant 1 : index
    %c0_102 = arith.constant 0 : index
    %c0_103 = arith.constant 0 : index
    %265 = vector.load %arg5[%c1_101, %c0_102, %c0_103] : memref<2x32x64xbf16, #tpu.memory_space<vmem>>, vector<1x32x64xbf16>
    %266 = vector.shape_cast %265 : vector<1x32x64xbf16> to vector<32x64xbf16>
    %cst_104 = arith.constant dense<0.000000e+00> : vector<16x64xf32>
    %267 = tpu.matmul %264, %266, %cst_104 {dimension_numbers = #tpu.dot_dimension_numbers<[1], [0], [0], [1], [0, 0, 1, 1], [], []>} : vector<16x32xbf16>, vector<32x64xbf16>, vector<16x64xf32> -> vector<16x64xf32>
    %268 = vector.broadcast %188 : vector<1x64xf32> to vector<16x64xf32>
    %269 = arith.addf %267, %268 : vector<16x64xf32>
    %cst_105 = arith.constant 0.000000e+00 : f32
    %270 = vector.broadcast %cst_105 : f32 to vector<16x64xf32>
    %271 = arith.maximumf %269, %270 : vector<16x64xf32>
    %272 = arith.truncf %271 : vector<16x64xf32> to vector<16x64xbf16>
    %c1_106 = arith.constant 1 : index
    %c0_107 = arith.constant 0 : index
    %c0_108 = arith.constant 0 : index
    %273 = vector.load %arg6[%c1_106, %c0_107, %c0_108] : memref<2x64x32xbf16, #tpu.memory_space<vmem>>, vector<1x64x32xbf16>
    %274 = vector.shape_cast %273 : vector<1x64x32xbf16> to vector<64x32xbf16>
    %cst_109 = arith.constant dense<0.000000e+00> : vector<16x32xf32>
    %275 = tpu.matmul %272, %274, %cst_109 {dimension_numbers = #tpu.dot_dimension_numbers<[1], [0], [0], [1], [0, 0, 1, 1], [], []>} : vector<16x64xbf16>, vector<64x32xbf16>, vector<16x32xf32> -> vector<16x32xf32>
    %276 = vector.broadcast %189 : vector<1x32xf32> to vector<16x32xf32>
    %277 = arith.addf %275, %276 : vector<16x32xf32>
    %278 = arith.addf %263, %277 : vector<16x32xf32>
    %cst_110 = arith.constant dense<0.000000e+00> : vector<16xf32>
    %279 = vector.multi_reduction <add>, %278, %cst_110 [1] : vector<16x32xf32> to vector<16xf32>
    %280 = vector.shape_cast %279 : vector<16xf32> to vector<16x1xf32>
    %cst_111 = arith.constant 3.200000e+01 : f32
    %281 = vector.broadcast %cst_111 : f32 to vector<16x1xf32>
    %282 = arith.divf %280, %281 : vector<16x1xf32>
    %283 = vector.broadcast %282 : vector<16x1xf32> to vector<16x32xf32>
    %284 = arith.subf %278, %283 : vector<16x32xf32>
    %285 = arith.mulf %284, %284 : vector<16x32xf32>
    %cst_112 = arith.constant dense<0.000000e+00> : vector<16xf32>
    %286 = vector.multi_reduction <add>, %285, %cst_112 [1] : vector<16x32xf32> to vector<16xf32>
    %287 = vector.shape_cast %286 : vector<16xf32> to vector<16x1xf32>
    %cst_113 = arith.constant 3.200000e+01 : f32
    %288 = vector.broadcast %cst_113 : f32 to vector<16x1xf32>
    %289 = arith.divf %287, %288 : vector<16x1xf32>
    %290 = vector.broadcast %282 : vector<16x1xf32> to vector<16x32xf32>
    %291 = arith.subf %278, %290 : vector<16x32xf32>
    %cst_114 = arith.constant 9.99999974E-6 : f32
    %292 = vector.broadcast %cst_114 : f32 to vector<16x1xf32>
    %293 = arith.addf %289, %292 : vector<16x1xf32>
    %294 = math.rsqrt %293 : vector<16x1xf32>
    %295 = vector.broadcast %294 : vector<16x1xf32> to vector<16x32xf32>
    %296 = arith.mulf %291, %295 : vector<16x32xf32>
    %297 = vector.broadcast %190 : vector<1x32xf32> to vector<16x32xf32>
    %298 = arith.mulf %296, %297 : vector<16x32xf32>
    %299 = vector.broadcast %191 : vector<1x32xf32> to vector<16x32xf32>
    %300 = arith.addf %298, %299 : vector<16x32xf32>
    %301 = vector.extract_strided_slice %66 {offsets = [16, 0], sizes = [1, 128], strides = [1, 1]} : vector<17x128xf32> to vector<1x128xf32>
    %302 = arith.truncf %300 : vector<16x32xf32> to vector<16x32xbf16>
    %c0_115 = arith.constant 0 : index
    %c0_116 = arith.constant 0 : index
    %303 = vector.load %arg7[%c0_115, %c0_116] : memref<32x128xbf16, #tpu.memory_space<vmem>>, vector<32x128xbf16>
    %cst_117 = arith.constant dense<0.000000e+00> : vector<16x128xf32>
    %304 = tpu.matmul %302, %303, %cst_117 {dimension_numbers = #tpu.dot_dimension_numbers<[1], [0], [0], [1], [0, 0, 1, 1], [], []>} : vector<16x32xbf16>, vector<32x128xbf16>, vector<16x128xf32> -> vector<16x128xf32>
    %305 = vector.broadcast %301 : vector<1x128xf32> to vector<16x128xf32>
    %306 = arith.addf %304, %305 : vector<16x128xf32>
    %c0_118 = arith.constant 0 : index
    %c0_119 = arith.constant 0 : index
    %307 = vector.load %arg9[%c0_118, %c0_119] : memref<16x128xf32, #tpu.memory_space<vmem>>, vector<16x128xf32>
    tpu.vector_store %arg9[%c0_118, %c0_119], %306 {strides = array<i32>} : memref<16x128xf32, #tpu.memory_space<vmem>>, vector<16x128xf32>,
    return
  }
}

</mosaic_0001>

<bundles_post_ra>
// kernel: testllm_forward.1
= control target key start
LH: loop header
LB: loop body
LE: loop exit
PB: predicated region body
PF: predicated region fallthrough
CT: control target
= control target key end

     0   :  { %14 = vsyncpa [#allocation6], 0  ;;  %s2752_s0 = inlined_call_operand.vmem [shape: s32[16], index: 0, kind: input, shape index: {}]   ;;  %s2753_s1 = inlined_call_operand.vmem [shape: f32[64,32], index: 1, kind: input, shape index: {}]   ;;  %s2754_s2 = inlined_call_operand.vmem [shape: f32[64,64], index: 2, kind: input, shape index: {}]   ;;  %s2755_s3 = inlined_call_operand.vmem [shape: bf16[2,32,96], index: 3, kind: input, shape index: {}]   ;;  %s2756_s4 = inlined_call_operand.vmem [shape: bf16[2,32,32], index: 4, kind: input, shape index: {}]   ;;  %s2757_s5 = inlined_call_operand.vmem [shape: bf16[2,32,64], index: 5, kind: input, shape index: {}]   ;;  %s2758_s6 = inlined_call_operand.vmem [shape: bf16[2,64,32], index: 6, kind: input, shape index: {}]   ;;  %s2759_s7 = inlined_call_operand.hbm [shape: bf16[32,128], index: 7, kind: input, shape index: {}]   ;;  %s2760_s8 = inlined_call_operand.hbm [shape: f32[17,128], index: 8, kind: input, shape index: {}]   ;;  %s2761_s9 = inlined_call_operand.hbm [shape: f32[16,128], index: 9, kind: output, shape index: {}]  }
   0x1   :  { %15 = vsyncpa [#allocation4], 0 }
   0x2   :  { %16 = vsyncpa [#allocation9], 0 }
   0x3   :  { %17 = vsyncpa [#allocation5], 0  ;;  %s24_s11 = sshll.u32 %s2752_s0, 4  ;;  %s25_s11 = int_to_ptr.vmem [resolvable:$true] %s24_s11 }
   0x4   :  { %s2129_s12 = scalar_lea.vmem %s25_s11, 16  ;;  %p2134_p1 = scmp.lt.s32.totalorder %s25_s11, %s25_s11 }
   0x5   :  { %p2130_p0 = scmp.ne.s32.totalorder %s25_s11, %s2129_s12  ;;  %p2135_p2 = scmp.lt.s32.totalorder %s2129_s12, %s2129_s12 }
   0x7   :  { %p2136_p3 = por %p2135_p2, %p2134_p1 }
   0x9   :  { %p2137_p4 = pnand %p2136_p3, %p2130_p0 }
   0xb   :  { %2140 = shalt.err (!%p2137_p4)
}
   0xc   :  { %s2209_s13 = smov [#allocation3]   ;;  %s2210_s14 = smov [#allocation7]  }
   0xd   :  { %27 = dma.vmem_to_smem %s25_s11, 16, %s2209_s13, [#allocation6]  }
   0xe   :  { %s45_s15 = sshll.u32 %s2210_s14, 4  ;;  %s46_s15 = int_to_ptr.vmem [resolvable:$true] %s45_s15 }
   0xf   :  { %s2149_s16 = scalar_lea.vmem %s46_s15, 256  ;;  %p2154_p6 = scmp.lt.s32.totalorder %s46_s15, %s46_s15 }
  0x10   :  { %p2150_p5 = scmp.ne.s32.totalorder %s46_s15, %s2149_s16  ;;  %p2155_p7 = scmp.lt.s32.totalorder %s2149_s16, %s2149_s16 }
  0x12   :  { %p2156_p8 = por %p2155_p7, %p2154_p6 }
  0x14   :  { %p2157_p9 = pnand %p2156_p8, %p2150_p5 }
  0x16   :  { %2160 = shalt.err (!%p2157_p9)
}
  0x17   :  { %s2211_s0 = smov 64   ;;  %s2212_s17 = smov 4  }
  0x18   :  { %51 = dma.hbm_to_vmem [thread:$0]  %s2759_s7, 256, %s46_s15, [#allocation4], %s2211_s0, %s2211_s0, %s2212_s17  }
  0x19   :  { %s2213_s20 = smov [#allocation8]  }
  0x1a   :  { %s57_s21 = sshll.u32 %s2213_s20, 4  ;;  %s58_s21 = int_to_ptr.vmem [resolvable:$true] %s57_s21 }
  0x1b   :  { %s2169_s22 = scalar_lea.vmem %s58_s21, 384  ;;  %p2174_p11 = scmp.lt.s32.totalorder %s58_s21, %s58_s21 }
  0x1c   :  { %p2170_p10 = scmp.ne.s32.totalorder %s58_s21, %s2169_s22  ;;  %p2175_p12 = scmp.lt.s32.totalorder %s2169_s22, %s2169_s22 }
  0x1e   :  { %p2176_p13 = por %p2175_p12, %p2174_p11 }
  0x20   :  { %p2177_p0 = pnand %p2176_p13, %p2170_p10 }
  0x22   :  { %2180 = shalt.err (!%p2177_p0)
}
  0x23   :  { %s2214_s23 = smov 128   ;;  %s2215_s24 = smov 8  }
  0x24   :  { %63 = dma.hbm_to_vmem [thread:$0]  %s2760_s8, 384, %s58_s21, [#allocation9], %s2214_s23, %s2214_s23, %s2215_s24  }
  0x25   :  { %2201 = dma.done.wait [#allocation6], 16  }
  0x26   :  { %2202 = vsyncadd [#allocation6], 4294967280 }
  0x27   :  { %2203 = dma.done.wait [#allocation4], 256  }
  0x28   :  { %2204 = vsyncadd [#allocation4], 4294967040 }
  0x29   :  { %2205 = dma.done.wait [#allocation9], 384  }
  0x2a   :  { %2206 = vsyncadd [#allocation9], 4294966912 }
  0x2b   :  { %73 = sfence }
  0x2c   :  { %v2027_v0 = vld [vmem:[%s2755_s3 + $0x8] sm:$0xff]   ;;  %v2216_v1 = vmov 0.0   ;;  %v2028_v2 = vld [vmem:[%s2755_s3] sm:$0xff]   ;;  %vm2217_vm0 = vmmov 0   ;;  %s75_s8 = sld [smem:[#allocation3]]  ;;  %vm78_vm1 = vcmask 253952   ;;  %v158_v22 = vlaneseq }
  0x2d   :  { %1799 = vmatprep.subr.bf16.mxu0 %v2216_v1  ;;  %1803 = vmatprep.mubr.msk.bf16.mxu0 %vm2217_vm0, %v2216_v1  ;;  %s1653_s30 = sld [smem:[#allocation3 + $0x1]]  ;;  %vm174_vm2 = vcmask 261120   ;;  %v2373_v25 = vld [vmem:[#allocation8] sm:$0xff]  ;;  %vm255_vm3 = vcmask 64512   ;;  %v2424_v58 = vld [vmem:[%s2754_s2 + $0x18] sm:$0xff]  ;;  %v2430_v61 = vld [vmem:[%s2754_s2 + $0x8] sm:$0xff] }
  0x2e   :  { %1800 = vmatpush3.bf16.msra.mxu0 %v2027_v0  ;;  %s1654_s10 = sld [smem:[#allocation3 + $0x2]]  ;;  %v2370_v23 = vshrl.u32 %v158_v22, 7  ;;  %v2419_v56 = vld [vmem:[%s2754_s2] sm:$0xff]  ;;  %vm345_vm4 = vcmask 523264   ;;  %v2437_v0 = vld [vmem:[%s2754_s2 + $0x10] sm:$0xff]  ;;  %vm553_vm5 = vcmask 130048  }
  0x2f   :  { %1801 = vmatprep.subr.bf16.mxu0 %v2216_v1  ;;  %s1655_s11 = sld [smem:[#allocation3 + $0x3]]  ;;  %vm556_vm6 = vcmask 195584  }
  0x30   :  { %s1656_s12 = sld [smem:[#allocation3 + $0x4]]  ;;  %v160_v24 = vsub.s32 0, %v2370_v23 }
  0x31   :  { %s1657_s13 = sld [smem:[#allocation3 + $0x5]] }
  0x32   :  { %1802 = vmatpush3.bf16.msra.mxu0 %v2028_v2  ;;  %s76_s16 = scalar_lea.vmem %s2753_s1, %s75_s8  ;;  %s1658_s17 = sld [smem:[#allocation3 + $0x6]]  ;;  %v161_v27 = vrot.slane %v2373_v25, %v160_v24 }
  0x33   :  { %v77_v3 = vld [vmem:[%s76_s16] sm:$0x1]  ;;  %s81_s20 = scalar_lea.vmem %s2753_s1, %s1653_s30  ;;  %s1659_s21 = sld [smem:[#allocation3 + $0x7]] }
  0x34   :  { %79 = vst.msk [vmem:[#allocation2] sm:$0x1] %vm78_vm1, %v77_v3  ;;  %v82_v4 = vld [vmem:[%s81_s20] sm:$0x1]  ;;  %s85_s26 = scalar_lea.vmem %s2753_s1, %s1654_s10  ;;  %s1660_s7 = sld [smem:[#allocation3 + $0x8]] }
  0x35   :  { %83 = vst.msk [vmem:[#allocation2 + $0x1] sm:$0x1] %vm78_vm1, %v82_v4  ;;  %v86_v5 = vld [vmem:[%s85_s26] sm:$0x1]  ;;  %s89_s29 = scalar_lea.vmem %s2753_s1, %s1655_s11  ;;  %s1661_s8 = sld [smem:[#allocation3 + $0x9]] }
  0x36   :  { %87 = vst.msk [vmem:[#allocation2 + $0x2] sm:$0x1] %vm78_vm1, %v86_v5  ;;  %v90_v6 = vld [vmem:[%s89_s29] sm:$0x1]  ;;  %s93_s15 = scalar_lea.vmem %s2753_s1, %s1656_s12  ;;  %s1662_s16 = sld [smem:[#allocation3 + $0xa]] }
  0x37   :  { %91 = vst.msk [vmem:[#allocation2 + $0x3] sm:$0x1] %vm78_vm1, %v90_v6  ;;  %v94_v7 = vld [vmem:[%s93_s15] sm:$0x1]  ;;  %s97_s19 = scalar_lea.vmem %s2753_s1, %s1657_s13  ;;  %s1663_s20 = sld [smem:[#allocation3 + $0xb]] }
  0x38   :  { %95 = vst.msk [vmem:[#allocation2 + $0x4] sm:$0x1] %vm78_vm1, %v94_v7  ;;  %v98_v8 = vld [vmem:[%s97_s19] sm:$0x1]  ;;  %s101_s25 = scalar_lea.vmem %s2753_s1, %s1658_s17  ;;  %s1664_s26 = sld [smem:[#allocation3 + $0xc]] }
  0x39   :  { %99 = vst.msk [vmem:[#allocation2 + $0x5] sm:$0x1] %vm78_vm1, %v98_v8  ;;  %v102_v9 = vld [vmem:[%s101_s25] sm:$0x1]  ;;  %s105_s28 = scalar_lea.vmem %s2753_s1, %s1659_s21  ;;  %s1665_s29 = sld [smem:[#allocation3 + $0xd]] }
  0x3a   :  { %103 = vst.msk [vmem:[#allocation2 + $0x6] sm:$0x1] %vm78_vm1, %v102_v9  ;;  %v106_v10 = vld [vmem:[%s105_s28] sm:$0x1]  ;;  %s109_s14 = scalar_lea.vmem %s2753_s1, %s1660_s7  ;;  %s1666_s15 = sld [smem:[#allocation3 + $0xe]] }
  0x3b   :  { %107 = vst.msk [vmem:[#allocation2 + $0x7] sm:$0x1] %vm78_vm1, %v106_v10  ;;  %v110_v11 = vld [vmem:[%s109_s14] sm:$0x1]  ;;  %s113_s18 = scalar_lea.vmem %s2753_s1, %s1661_s8  ;;  %s1667_s19 = sld [smem:[#allocation3 + $0xf]] }
  0x3c   :  { %111 = vst.msk [vmem:[#allocation2 + $0x8] sm:$0x1] %vm78_vm1, %v110_v11  ;;  %v114_v12 = vld [vmem:[%s113_s18] sm:$0x1]  ;;  %s117_s22 = scalar_lea.vmem %s2753_s1, %s1662_s16  ;;  %v2451_v11 = vld [vmem:[%s2754_s2 + $0x28] sm:$0xff]  ;;  %s2222_s11 = smov 24  }
  0x3d   :  { %115 = vst.msk [vmem:[#allocation2 + $0x9] sm:$0x1] %vm78_vm1, %v114_v12  ;;  %v118_v13 = vld [vmem:[%s117_s22] sm:$0x1]  ;;  %s121_s12 = scalar_lea.vmem %s2753_s1, %s1663_s20  ;;  %s2223_s22 = smov 16  }
  0x3e   :  { %119 = vst.msk [vmem:[#allocation2 + $0xa] sm:$0x1] %vm78_vm1, %v118_v13  ;;  %v122_v14 = vld [vmem:[%s121_s12] sm:$0x1]  ;;  %s125_s28 = scalar_lea.vmem %s2753_s1, %s1664_s26 }
  0x3f   :  { %123 = vst.msk [vmem:[#allocation2 + $0xb] sm:$0x1] %vm78_vm1, %v122_v14  ;;  %v126_v15 = vld [vmem:[%s125_s28] sm:$0x1]  ;;  %s129_s16 = scalar_lea.vmem %s2753_s1, %s1665_s29  ;;  %s2219_s29 = smov 104   ;;  %v2458_v14 = vld [vmem:[%s2754_s2 + $0x30] sm:$0xff] }
  0x40   :  { %127 = vst.msk [vmem:[#allocation2 + $0xc] sm:$0x1] %vm78_vm1, %v126_v15  ;;  %v130_v16 = vld [vmem:[%s129_s16] sm:$0x1]  ;;  %s133_s20 = scalar_lea.vmem %s2753_s1, %s1666_s15  ;;  %s2220_s15 = smov 112   ;;  %v2463_v15 = vld [vmem:[%s2754_s2 + $0x38] sm:$0xff] }
  0x41   :  { %131 = vst.msk [vmem:[#allocation2 + $0xd] sm:$0x1] %vm78_vm1, %v130_v16  ;;  %v134_v17 = vld [vmem:[%s133_s20] sm:$0x1]  ;;  %s137_s26 = scalar_lea.vmem %s2753_s1, %s1667_s19  ;;  %s2218_s1 = smov 120  }
  0x42   :  { %135 = vst.msk [vmem:[#allocation2 + $0xe] sm:$0x1] %vm78_vm1, %v134_v17  ;;  %v138_v18 = vld [vmem:[%s137_s26] sm:$0x1]  ;;  %s2221_s19 = smov 96  }
  0x43   :  { %139 = vst.msk [vmem:[#allocation2 + $0xf] sm:$0x1] %vm78_vm1, %v138_v18  ;;  %v2363_v19 = vld [vmem:[#allocation2] sm:$0xff] }
  0x44   :  { %v2446_v9 = vld [vmem:[%s2754_s2 + $0x20] sm:$0xff] }
  0x4a   :  { %v2365_v20 = vld [vmem:[#allocation2 + $0x8] sm:$0xff] }
  0x4b   :  { %v153_v21 = vpack.c.bf16 %v2365_v20, %v2363_v19 }
  0x4d   :  { %1804 = vmatmul.mubr.msk.bf16.vlgmr.msra.gmra.mxu0 %vm174_vm2, %v153_v21 }
 0x10d   :  { %v212_v26 = vpop.f32.mrf.mxu0 }
 0x10e   :  { %v213_v30 = vadd.f32 %v212_v26, %v161_v27 }
 0x10f   :  { %v1805_v28 = vpop.f32.mrf.mxu0 }
 0x111   :  { %v215_v29 = vpop.f32.mrf.mxu0 }
 0x112   :  { %v216_v31 = vadd.f32 %v215_v29, %v161_v27 }
 0x113   :  { %v1806_v32 = vpop.f32.mrf.mxu0 }
 0x114   :  { %v1977_v33 = vpack.i.bf16 %v216_v31, %v213_v30  ;;  %v2378_v34 = vpack.c.bf16 %v216_v31, %v213_v30 }
 0x116   :  { %1978 = vrot.lane.b32.xlu1 %v1977_v33, %s2218_s1  ;;  %1968 = vrot.lane.b32.xlu0 %v1977_v33, %s2219_s29 }
 0x117   :  { %1815 = vmatprep.mubr.msk.bf16.mxu1 %vm255_vm3, %v2378_v34 }
 0x11a   :  { %1973 = vrot.lane.b32.xlu0 %v1977_v33, %s2220_s15 }
 0x188   :  { %v1979_v35 = vpop.permute.xlu1 %1978  ;;  %v1969_v36 = vpop.permute.xlu0 %1968 }
 0x189   :  { %v1971_v37 = vunpack.i.h.bf16 %v1969_v36  ;;  %v1970_v38 = vunpack.i.l.bf16 %v1969_v36  ;;  %v1981_v39 = vunpack.i.h.bf16 %v1979_v35  ;;  %v1980_v40 = vunpack.i.l.bf16 %v1979_v35 }
 0x18b   :  { %v2385_v41 = vpack.c.bf16 %v1971_v37, %v1970_v38  ;;  %v2389_v45 = vpack.c.bf16 %v1981_v39, %v1980_v40 }
 0x18c   :  { %v1974_v42 = vpop.permute.xlu0 %1973 }
 0x18d   :  { %v1976_v43 = vunpack.i.h.bf16 %v1974_v42  ;;  %v1975_v44 = vunpack.i.l.bf16 %v1974_v42  ;;  %253 = vrot.lane.b32.xlu1 %v2385_v41, %s2221_s19 }
 0x18f   :  { %v2391_v46 = vpack.c.bf16 %v1976_v43, %v1975_v44 }
 0x191   :  { %251 = vrot.lane.b32.xlu0 %v2391_v46, %s2221_s19  ;;  %249 = vrot.lane.b32.xlu1 %v2389_v45, %s2221_s19 }
 0x195   :  { %247 = vrot.lane.b32.xlu0 %v2378_v34, %s2221_s19 }
 0x1ff   :  { %v254_v47 = vpop.permute.xlu1 %253 }
 0x200   :  { %1943 = vmatprep.subr.msk.bf16.mxu1 %vm255_vm3, %v254_v47  ;;  %v278_v48 = vsel %vm255_vm3, %v254_v47, 0 }
 0x201   :  { %1808 = vmatpush3.bf16.xpose.msra.mxu1 %v278_v48 }
 0x203   :  { %v252_v49 = vpop.permute.xlu0 %251  ;;  %v250_v51 = vpop.permute.xlu1 %249 }
 0x204   :  { %1944 = vmatprep.subr.msk.bf16.mxu1 %vm255_vm3, %v252_v49  ;;  %v275_v50 = vsel %vm255_vm3, %v252_v49, 0  ;;  %v272_v52 = vsel %vm255_vm3, %v250_v51, 0 }
 0x207   :  { %v248_v53 = vpop.permute.xlu0 %247 }
 0x208   :  { %v269_v54 = vsel %vm255_vm3, %v248_v53, 0 }
 0x209   :  { %1810 = vmatpush3.bf16.xpose.msra.mxu1 %v275_v50 }
 0x20a   :  { %1945 = vmatprep.subr.msk.bf16.mxu1 %vm255_vm3, %v250_v51 }
 0x211   :  { %1812 = vmatpush3.bf16.xpose.msra.mxu1 %v272_v52 }
 0x212   :  { %1946 = vmatprep.subr.msk.bf16.mxu1 %vm255_vm3, %v248_v53 }
 0x219   :  { %1814 = vmatpush3.bf16.xpose.msra.mxu1 %v269_v54 }
 0x21a   :  { %1855 = vmatprep.subr.bf16.mxu1 %v2216_v1 }
 0x220   :  { %1816 = vmatmul.mubr.msk.bf16.vlgmr.msra.gmra.mxu1 %vm255_vm3, %v2389_v45 }
 0x221   :  { %1819 = vmatprep.mubr.msk.bf16.mxu1 %vm255_vm3, %v2391_v46 }
 0x228   :  { %1820 = vmatmul.mubr.msk.bf16.gmra.mxu1 %vm255_vm3, %v2385_v41 }
 0x229   :  { %1863 = vmatprep.mubr.msk.bf16.mxu1 %vm2217_vm0, %v2216_v1 }
 0x2e0   :  { %v1817_v55 = vpop.f32.mrf.mxu1 }
 0x2e1   :  { %v323_v5 = vadd.f32 %v1817_v55, %v2437_v0 }
 0x2e2   :  { %v314_v57 = vpop.f32.mrf.mxu1 }
 0x2e3   :  { %v315_v59 = vadd.f32 %v314_v57, %v2419_v56  ;;  %v352_v13 = vsel %vm345_vm4, %v323_v5, -inf }
 0x2e4   :  { %v1818_v60 = vpop.f32.mrf.mxu1 }
 0x2e5   :  { %v326_v62 = vadd.f32 %v1818_v60, %v2424_v58  ;;  %v346_v63 = vsel %vm345_vm4, %v315_v59, -inf }
 0x2e6   :  { %v317_v2 = vpop.f32.mrf.mxu1  ;;  %347 = vmax.xlane.f32.xlu1 %v346_v63 }
 0x2e7   :  { %v318_v3 = vadd.f32 %v317_v2, %v2430_v61  ;;  %v355_v7 = vsel %vm345_vm4, %v326_v62, -inf }
 0x2e8   :  { %v1821_v4 = vpop.f32.mrf.mxu1 }
 0x2e9   :  { %v349_v6 = vsel %vm345_vm4, %v318_v3, -inf  ;;  %v339_v18 = vadd.f32 %v1821_v4, %v2458_v14 }
 0x2ea   :  { %v330_v8 = vpop.f32.mrf.mxu1  ;;  %350 = vmax.xlane.f32.xlu0 %v349_v6  ;;  %356 = vmax.xlane.f32.xlu1 %v355_v7 }
 0x2eb   :  { %v331_v12 = vadd.f32 %v330_v8, %v2446_v9  ;;  %v364_v27 = vsel %vm345_vm4, %v339_v18, -inf }
 0x2ec   :  { %v1822_v10 = vpop.f32.mrf.mxu1 }
 0x2ed   :  { %v342_v21 = vadd.f32 %v1822_v10, %v2463_v15  ;;  %v358_v22 = vsel %vm345_vm4, %v331_v12, -inf }
 0x2ee   :  { %v333_v16 = vpop.f32.mrf.mxu1  ;;  %353 = vmax.xlane.f32.xlu0 %v352_v13 }
 0x2ef   :  { %v334_v17 = vadd.f32 %v333_v16, %v2451_v11  ;;  %v367_v28 = vsel %vm345_vm4, %v342_v21, -inf }
 0x2f1   :  { %v361_v26 = vsel %vm345_vm4, %v334_v17, -inf }
 0x2f2   :  { %359 = vmax.xlane.f32.xlu0 %v358_v22  ;;  %362 = vmax.xlane.f32.xlu1 %v361_v26 }
 0x2f6   :  { %365 = vmax.xlane.f32.xlu0 %v364_v27  ;;  %368 = vmax.xlane.f32.xlu1 %v367_v28 }
 0x307   :  { %442 = vrot.lane.b32.xlu1 %v2391_v46, %s2211_s0 }
 0x30c   :  { %444 = vrot.lane.b32.xlu0 %v2385_v41, %s2211_s0 }
 0x36f   :  { %v348_v29 = vpop.xlane.xlu1 %347 }
 0x370   :  { %v370_v35 = vsub.f32 %v315_v59, %v348_v29 }
 0x372   :  { %v378_v40 = vmul.f32 1.442695, %v370_v35 }
 0x373   :  { %v351_v30 = vpop.xlane.xlu0 %350  ;;  %v357_v31 = vpop.xlane.xlu1 %356 }
 0x374   :  { %v371_v32 = vsub.f32 %v318_v3, %v351_v30  ;;  %v373_v33 = vsub.f32 %v326_v62, %v357_v31 }
 0x376   :  { %v384_v36 = vmul.f32 1.442695, %v373_v33  ;;  %v380_v37 = vmul.f32 1.442695, %v371_v32 }
 0x377   :  { %v354_v38 = vpop.xlane.xlu0 %353 }
 0x378   :  { %v372_v39 = vsub.f32 %v323_v5, %v354_v38  ;;  %2049 = vpow2.f32 %v384_v36 }
 0x379   :  { %2051 = vpow2.f32 %v380_v37 }
 0x37a   :  { %v382_v42 = vmul.f32 1.442695, %v372_v39 }
 0x37b   :  { %v360_v43 = vpop.xlane.xlu0 %359  ;;  %v363_v44 = vpop.xlane.xlu1 %362 }
 0x37c   :  { %2053 = vpow2.f32 %v382_v42  ;;  %v374_v46 = vsub.f32 %v331_v12, %v360_v43  ;;  %v375_v41 = vsub.f32 %v334_v17, %v363_v44 }
 0x37d   :  { %2055 = vpow2.f32 %v378_v40 }
 0x37e   :  { %v386_v51 = vmul.f32 1.442695, %v374_v46  ;;  %v388_v54 = vmul.f32 1.442695, %v375_v41 }
 0x37f   :  { %v366_v47 = vpop.xlane.xlu0 %365  ;;  %v369_v48 = vpop.xlane.xlu1 %368 }
 0x380   :  { %v376_v49 = vsub.f32 %v339_v18, %v366_v47  ;;  %v377_v50 = vsub.f32 %v342_v21, %v369_v48 }
 0x382   :  { %v390_v52 = vmul.f32 1.442695, %v376_v49  ;;  %v392_v53 = vmul.f32 1.442695, %v377_v50 }
 0x383   :  { %v445_v55 = vpop.permute.xlu0 %444  ;;  %v443_v57 = vpop.permute.xlu1 %442 }
 0x384   :  { %2057 = vpow2.f32 %v390_v52  ;;  %1823 = vmatprep.subr.bf16.mxu0 %v445_v55 }
 0x385   :  { %2059 = vpow2.f32 %v392_v53  ;;  %1824 = vmatpush3.bf16.msra.mxu0 %v445_v55  ;;  %v2050_v59 = vpop.eup %2049  ;;  %v2029_v53 = vld [vmem:[%s2756_s4 + $0x8] sm:$0xff]  }
 0x386   :  { %2061 = vpow2.f32 %v386_v51  ;;  %1825 = vmatprep.subr.bf16.mxu0 %v443_v57  ;;  %v403_v60 = vsel %vm345_vm4, %v2050_v59, 0.0  ;;  %v2052_v62 = vpop.eup %2051 }
 0x387   :  { %2063 = vpow2.f32 %v388_v54  ;;  %404 = vadd.xlane.f32.xlu1 %v403_v60  ;;  %v397_v4 = vsel %vm345_vm4, %v2052_v62, 0.0 }
 0x389   :  { %v2054_v63 = vpop.eup %2053  ;;  %1826 = vmatpush3.bf16.msra.mxu0 %v443_v57  ;;  %v2030_v57 = vld [vmem:[%s2756_s4] sm:$0xff]  }
 0x38a   :  { %v400_v2 = vsel %vm345_vm4, %v2054_v63, 0.0  ;;  %v2056_v3 = vpop.eup %2055 }
 0x38b   :  { %401 = vadd.xlane.f32.xlu0 %v400_v2  ;;  %398 = vadd.xlane.f32.xlu1 %v397_v4  ;;  %v394_v5 = vsel %vm345_vm4, %v2056_v3, 0.0 }
 0x38f   :  { %395 = vadd.xlane.f32.xlu0 %v394_v5 }
 0x391   :  { %v2058_v6 = vpop.eup %2057 }
 0x392   :  { %v2060_v7 = vpop.eup %2059  ;;  %v412_v8 = vsel %vm345_vm4, %v2058_v6, 0.0 }
 0x393   :  { %v2062_v10 = vpop.eup %2061  ;;  %413 = vadd.xlane.f32.xlu0 %v412_v8  ;;  %v415_v12 = vsel %vm345_vm4, %v2060_v7, 0.0 }
 0x394   :  { %v2064_v13 = vpop.eup %2063  ;;  %416 = vadd.xlane.f32.xlu1 %v415_v12  ;;  %v406_v16 = vsel %vm345_vm4, %v2062_v10, 0.0 }
 0x395   :  { %v409_v17 = vsel %vm345_vm4, %v2064_v13, 0.0 }
 0x397   :  { %407 = vadd.xlane.f32.xlu0 %v406_v16 }
 0x398   :  { %410 = vadd.xlane.f32.xlu1 %v409_v17 }
 0x3a9   :  { %440 = vrot.lane.b32.xlu1 %v2389_v45, %s2211_s0 }
 0x3ad   :  { %438 = vrot.lane.b32.xlu0 %v2378_v34, %s2211_s0 }
 0x410   :  { %v405_v18 = vpop.xlane.xlu1 %404 }
 0x414   :  { %v402_v21 = vpop.xlane.xlu0 %401  ;;  %v399_v22 = vpop.xlane.xlu1 %398 }
 0x415   :  { %2065 = vrcp.f32 %v399_v22 }
 0x416   :  { %2067 = vrcp.f32 %v402_v21 }
 0x418   :  { %v396_v26 = vpop.xlane.xlu0 %395 }
 0x419   :  { %2069 = vrcp.f32 %v396_v26 }
 0x41a   :  { %2071 = vrcp.f32 %v405_v18 }
 0x41c   :  { %v414_v27 = vpop.xlane.xlu0 %413 }
 0x41d   :  { %v417_v28 = vpop.xlane.xlu1 %416  ;;  %2073 = vrcp.f32 %v414_v27 }
 0x41e   :  { %2075 = vrcp.f32 %v417_v28 }
 0x420   :  { %v408_v29 = vpop.xlane.xlu0 %407 }
 0x421   :  { %2077 = vrcp.f32 %v408_v29  ;;  %v411_v30 = vpop.xlane.xlu1 %410 }
 0x422   :  { %2079 = vrcp.f32 %v411_v30  ;;  %v2066_v45 = vpop.eup %2065 }
 0x423   :  { %v2068_v31 = vpop.eup %2067  ;;  %v427_v37 = vmul.f32 %v2066_v45, %v2052_v62 }
 0x424   :  { %v439_v35 = vpop.permute.xlu0 %438  ;;  %v428_v38 = vmul.f32 %v2068_v31, %v2054_v63  ;;  %v566_v31 = vsub.s32 1, %v2370_v23 }
 0x425   :  { %v441_v32 = vpop.permute.xlu1 %440 }
 0x426   :  { %v2070_v34 = vpop.eup %2069  ;;  %1827 = vmatprep.subr.bf16.mxu0 %v441_v32 }
 0x427   :  { %v2072_v33 = vpop.eup %2071  ;;  %1828 = vmatpush3.bf16.msra.mxu0 %v441_v32  ;;  %v426_v36 = vmul.f32 %v2070_v34, %v2056_v3  ;;  %v567_v32 = vrot.slane %v2373_v25, %v566_v31 }
 0x428   :  { %1829 = vmatprep.subr.bf16.mxu0 %v439_v35  ;;  %v429_v40 = vmul.f32 %v2072_v33, %v2050_v59 }
 0x429   :  { %v434_v39 = vpack.c.bf16 %v427_v37, %v426_v36 }
 0x42a   :  { %v2074_v42 = vpop.eup %2073  ;;  %v435_v43 = vpack.c.bf16 %v429_v40, %v428_v38 }
 0x42b   :  { %1830 = vmatpush3.bf16.msra.mxu0 %v439_v35  ;;  %1831 = vmatprep.mubr.msk.bf16.mxu0 %vm345_vm4, %v434_v39  ;;  %v2076_v44 = vpop.eup %2075  ;;  %v432_v49 = vmul.f32 %v2074_v42, %v2058_v6 }
 0x42c   :  { %1839 = vmatprep.subr.bf16.mxu0 %v2216_v1  ;;  %v433_v50 = vmul.f32 %v2076_v44, %v2060_v7 }
 0x42e   :  { %v2078_v46 = vpop.eup %2077  ;;  %1832 = vmatmul.mubr.msk.bf16.vlgmr.msra.gmra.mxu0 %vm345_vm4, %v435_v43  ;;  %v437_v52 = vpack.c.bf16 %v433_v50, %v432_v49 }
 0x42f   :  { %v2080_v41 = vpop.eup %2079  ;;  %v430_v47 = vmul.f32 %v2078_v46, %v2062_v10  ;;  %1840 = vmatpush3.bf16.msra.mxu0 %v2029_v53  ;;  %v2032_v53 = vld [vmem:[%s2757_s5] sm:$0xff]  }
 0x430   :  { %v431_v48 = vmul.f32 %v2080_v41, %v2064_v13  ;;  %1841 = vmatprep.subr.bf16.mxu0 %v2216_v1 }
 0x432   :  { %v436_v51 = vpack.c.bf16 %v431_v48, %v430_v47 }
 0x433   :  { %1842 = vmatpush3.bf16.msra.mxu0 %v2030_v57 }
 0x434   :  { %1835 = vmatprep.mubr.msk.bf16.mxu0 %vm345_vm4, %v436_v51  ;;  %1847 = vmatprep.subr.bf16.mxu0 %v2216_v1 }
 0x436   :  { %1836 = vmatmul.mubr.msk.bf16.gmra.mxu0 %vm345_vm4, %v437_v52 }
 0x437   :  { %1843 = vmatprep.mubr.msk.bf16.mxu0 %vm2217_vm0, %v2216_v1 }
 0x4ee   :  { %v1833_v54 = vpop.f32.mrf.mxu0 }
 0x4f0   :  { %v496_v55 = vpop.f32.mrf.mxu0 }
 0x4f2   :  { %v1834_v59 = vpop.f32.mrf.mxu0 }
 0x4f3   :  { %v1982_v60 = vpack.i.bf16 %v1834_v59, %v1833_v54  ;;  %v2033_v54 = vld [vmem:[%s2758_s6 + $0x18] sm:$0xff]  }
 0x4f4   :  { %v499_v62 = vpop.f32.mrf.mxu0  ;;  %1856 = vmatpush3.bf16.msra.mxu1 %v2033_v54 }
 0x4f5   :  { %1983 = vrot.lane.b32.xlu1 %v1982_v60, %s2215_s24  ;;  %1857 = vmatprep.subr.bf16.mxu1 %v2216_v1 }
 0x4f6   :  { %v1837_v63 = vpop.f32.mrf.mxu0 }
 0x4f8   :  { %v512_v2 = vpop.f32.mrf.mxu0 }
 0x4fa   :  { %v1838_v3 = vpop.f32.mrf.mxu0 }
 0x4fb   :  { %v1992_v4 = vpack.i.bf16 %v1838_v3, %v1837_v63  ;;  %v655_v3 = vsub.s32 2, %v2370_v23 }
 0x4fc   :  { %v515_v5 = vpop.f32.mrf.mxu0 }
 0x4fd   :  { %v1987_v6 = vpack.i.bf16 %v515_v5, %v512_v2  ;;  %1993 = vrot.lane.b32.xlu1 %v1992_v4, %s2222_s11 }
 0x4ff   :  { %1988 = vrot.lane.b32.xlu0 %v1987_v6, %s2223_s22  ;;  %v656_v6 = vrot.slane %v2373_v25, %v655_v3 }
 0x567   :  { %v1984_v7 = vpop.permute.xlu1 %1983 }
 0x568   :  { %v1986_v8 = vunpack.i.h.bf16 %v1984_v7  ;;  %v1985_v10 = vunpack.i.l.bf16 %v1984_v7  ;;  %v661_v7 = vsub.s32 3, %v2370_v23 }
 0x56a   :  { %v551_v18 = vsel %vm255_vm3, %v496_v55, %v1985_v10  ;;  %v552_v21 = vsel %vm255_vm3, %v499_v62, %v1986_v8  ;;  %v2034_v55 = vld [vmem:[%s2758_s6 + $0x10] sm:$0xff]  }
 0x56b   :  { %1858 = vmatpush3.bf16.msra.mxu1 %v2034_v55 }
 0x56c   :  { %1859 = vmatprep.subr.bf16.mxu1 %v2216_v1 }
 0x56f   :  { %v1994_v12 = vpop.permute.xlu1 %1993 }
 0x570   :  { %v1996_v22 = vunpack.i.h.bf16 %v1994_v12  ;;  %v1995_v26 = vunpack.i.l.bf16 %v1994_v12 }
 0x571   :  { %v1989_v13 = vpop.permute.xlu0 %1988 }
 0x572   :  { %v1991_v16 = vunpack.i.h.bf16 %v1989_v13  ;;  %v1990_v17 = vunpack.i.l.bf16 %v1989_v13  ;;  %v662_v13 = vrot.slane %v2373_v25, %v661_v7 }
 0x574   :  { %v555_v27 = vsel %vm553_vm5, %v552_v21, %v1991_v16  ;;  %v554_v28 = vsel %vm553_vm5, %v551_v18, %v1990_v17 }
 0x575   :  { %v558_v29 = vsel %vm556_vm6, %v555_v27, %v1996_v22  ;;  %v557_v30 = vsel %vm556_vm6, %v554_v28, %v1995_v26  ;;  %v2035_v22 = vld [vmem:[%s2758_s6 + $0x8] sm:$0xff]   ;;  %v2036_v26 = vld [vmem:[%s2758_s6] sm:$0xff]   ;;  %v672_v27 = vsub.s32 4, %v2370_v23 }
 0x576   :  { %v559_v45 = vpack.c.bf16 %v558_v29, %v557_v30  ;;  %1860 = vmatpush3.bf16.msra.mxu1 %v2035_v22 }
 0x577   :  { %1861 = vmatprep.subr.bf16.mxu1 %v2216_v1  ;;  %v673_v28 = vrot.slane %v2373_v25, %v672_v27 }
 0x578   :  { %1844 = vmatmul.mubr.msk.bf16.vlgmr.msra.gmra.mxu0 %vm174_vm2, %v559_v45 }
 0x579   :  { %1851 = vmatprep.mubr.msk.bf16.mxu0 %vm2217_vm0, %v2216_v1 }
 0x57a   :  { %1862 = vmatpush3.bf16.msra.mxu1 %v2036_v26 }
 0x638   :  { %v617_v34 = vpop.f32.mrf.mxu0 }
 0x639   :  { %v618_v33 = vadd.f32 %v617_v34, %v567_v32 }
 0x63a   :  { %v1845_v35 = vpop.f32.mrf.mxu0 }
 0x63b   :  { %v624_v36 = vadd.f32 %v618_v33, %v2363_v19 }
 0x63c   :  { %v620_v37 = vpop.f32.mrf.mxu0 }
 0x63d   :  { %v621_v38 = vadd.f32 %v620_v37, %v567_v32  ;;  %v626_v39 = vsel %vm174_vm2, %v624_v36, 0.0 }
 0x63e   :  { %627 = vadd.xlane.f32.xlu0 %v626_v39  ;;  %v1846_v40 = vpop.f32.mrf.mxu0 }
 0x63f   :  { %v625_v42 = vadd.f32 %v621_v38, %v2365_v20  ;;  %v2031_v20 = vld [vmem:[%s2757_s5 + $0x8] sm:$0xff]   ;;  %v743_v38 = vsub.s32 5, %v2370_v23 }
 0x640   :  { %1848 = vmatpush3.bf16.msra.mxu0 %v2031_v20 }
 0x641   :  { %v629_v43 = vsel %vm174_vm2, %v625_v42, 0.0  ;;  %1849 = vmatprep.subr.bf16.mxu0 %v2216_v1  ;;  %v744_v39 = vrot.slane %v2373_v25, %v743_v38 }
 0x642   :  { %630 = vadd.xlane.f32.xlu1 %v629_v43 }
 0x644   :  { %1850 = vmatpush3.bf16.msra.mxu0 %v2032_v53 }
 0x645   :  { %1867 = vmatprep.subr.bf16.mxu0 %v2216_v1 }
 0x6c7   :  { %v628_v44 = vpop.xlane.xlu0 %627 }
 0x6c8   :  { %v633_v46 = vmul.f32 0.03125, %v628_v44 }
 0x6ca   :  { %v635_v41 = vsub.f32 %v624_v36, %v633_v46 }
 0x6cb   :  { %v631_v47 = vpop.xlane.xlu1 %630 }
 0x6cc   :  { %v634_v48 = vmul.f32 0.03125, %v631_v47  ;;  %v637_v49 = vmul.f32 %v635_v41, %v635_v41 }
 0x6ce   :  { %v636_v50 = vsub.f32 %v625_v42, %v634_v48  ;;  %v639_v19 = vsel %vm174_vm2, %v637_v49, 0.0 }
 0x6cf   :  { %640 = vadd.xlane.f32.xlu0 %v639_v19 }
 0x6d0   :  { %v638_v51 = vmul.f32 %v636_v50, %v636_v50 }
 0x6d2   :  { %v642_v52 = vsel %vm174_vm2, %v638_v51, 0.0 }
 0x6d3   :  { %643 = vadd.xlane.f32.xlu0 %v642_v52 }
 0x758   :  { %v641_v57 = vpop.xlane.xlu0 %640 }
 0x759   :  { %v645_v59 = vmul.f32 0.03125, %v641_v57 }
 0x75b   :  { %v647_v60 = vadd.f32 1e-05, %v645_v59 }
 0x75c   :  { %v644_v62 = vpop.xlane.xlu0 %643 }
 0x75d   :  { %2081 = vrsqrt.f32 %v647_v60  ;;  %v646_v63 = vmul.f32 0.03125, %v644_v62  ;;  %v2037_v62 = vld [vmem:[%s2755_s3 + $0x18] sm:$0xff]  }
 0x75f   :  { %v648_v2 = vadd.f32 1e-05, %v646_v63  ;;  %v2038_v63 = vld [vmem:[%s2755_s3 + $0x10] sm:$0xff]  }
 0x761   :  { %2083 = vrsqrt.f32 %v648_v2 }
 0x76a   :  { %v2082_v4 = vpop.eup %2081 }
 0x76b   :  { %v651_v5 = vmul.f32 %v2082_v4, %v635_v41 }
 0x76d   :  { %v657_v12 = vmul.f32 %v656_v6, %v651_v5 }
 0x76e   :  { %v2084_v8 = vpop.eup %2083 }
 0x76f   :  { %v652_v10 = vmul.f32 %v2084_v8, %v636_v50  ;;  %v663_v17 = vadd.f32 %v662_v13, %v657_v12  ;;  %v843_v12 = vsub.s32 6, %v2370_v23 }
 0x771   :  { %v658_v16 = vmul.f32 %v656_v6, %v652_v10 }
 0x773   :  { %v664_v18 = vadd.f32 %v662_v13, %v658_v16 }
 0x775   :  { %v665_v21 = vpack.c.bf16 %v664_v18, %v663_v17 }
 0x777   :  { %1852 = vmatmul.mubr.msk.bf16.vlgmr.msra.gmra.mxu0 %vm174_vm2, %v665_v21 }
 0x778   :  { %1871 = vmatprep.mubr.msk.bf16.mxu0 %vm2217_vm0, %v2216_v1  ;;  %1868 = vmatpush3.bf16.msra.mxu0 %v2037_v62 }
 0x779   :  { %1869 = vmatprep.subr.bf16.mxu0 %v2216_v1 }
 0x77c   :  { %1870 = vmatpush3.bf16.msra.mxu0 %v2038_v63 }
 0x837   :  { %v723_v29 = vpop.f32.mrf.mxu0 }
 0x838   :  { %v724_v45 = vadd.f32 %v723_v29, %v673_v28 }
 0x839   :  { %v1853_v30 = vpop.f32.mrf.mxu0 }
 0x83a   :  { %v730_v35 = vmax.f32 %v724_v45, 0.0 }
 0x83b   :  { %v726_v32 = vpop.f32.mrf.mxu0 }
 0x83c   :  { %v727_v34 = vadd.f32 %v726_v32, %v673_v28 }
 0x83d   :  { %v1854_v33 = vpop.f32.mrf.mxu0 }
 0x83e   :  { %v731_v36 = vmax.f32 %v727_v34, 0.0  ;;  %v2594_v34 = vld [vmem:[#allocation8 + $0x8] sm:$0xff] }
 0x840   :  { %v732_v37 = vpack.c.bf16 %v731_v36, %v730_v35  ;;  %v862_v35 = vrot.slane %v2594_v34, %v160_v24 }
 0x842   :  { %1864 = vmatmul.mubr.msk.bf16.vlgmr.msra.gmra.mxu1 %vm345_vm4, %v732_v37 }
 0x902   :  { %v806_v40 = vpop.f32.mrf.mxu1 }
 0x903   :  { %v807_v42 = vadd.f32 %v806_v40, %v744_v39 }
 0x904   :  { %v1865_v43 = vpop.f32.mrf.mxu1 }
 0x905   :  { %v813_v44 = vadd.f32 %v807_v42, %v663_v17  ;;  %v844_v17 = vrot.slane %v2373_v25, %v843_v12 }
 0x906   :  { %v809_v46 = vpop.f32.mrf.mxu1 }
 0x907   :  { %v810_v41 = vadd.f32 %v809_v46, %v744_v39  ;;  %v815_v47 = vsel %vm174_vm2, %v813_v44, 0.0 }
 0x908   :  { %816 = vadd.xlane.f32.xlu1 %v815_v47  ;;  %v1866_v48 = vpop.f32.mrf.mxu1 }
 0x909   :  { %v814_v49 = vadd.f32 %v810_v41, %v664_v18  ;;  %v849_v18 = vsub.s32 7, %v2370_v23 }
 0x90b   :  { %v818_v50 = vsel %vm174_vm2, %v814_v49, 0.0  ;;  %v850_v28 = vrot.slane %v2373_v25, %v849_v18 }
 0x90c   :  { %819 = vadd.xlane.f32.xlu0 %v818_v50 }
 0x991   :  { %v817_v19 = vpop.xlane.xlu1 %816 }
 0x992   :  { %v821_v51 = vmul.f32 0.03125, %v817_v19 }
 0x994   :  { %v823_v52 = vsub.f32 %v813_v44, %v821_v51 }
 0x995   :  { %v820_v20 = vpop.xlane.xlu0 %819 }
 0x996   :  { %v822_v53 = vmul.f32 0.03125, %v820_v20  ;;  %v825_v54 = vmul.f32 %v823_v52, %v823_v52 }
 0x998   :  { %v824_v55 = vsub.f32 %v814_v49, %v822_v53  ;;  %v827_v57 = vsel %vm174_vm2, %v825_v54, 0.0 }
 0x999   :  { %828 = vadd.xlane.f32.xlu1 %v827_v57 }
 0x99a   :  { %v826_v59 = vmul.f32 %v824_v55, %v824_v55 }
 0x99c   :  { %v830_v60 = vsel %vm174_vm2, %v826_v59, 0.0 }
 0x99d   :  { %831 = vadd.xlane.f32.xlu0 %v830_v60 }
 0xa22   :  { %v829_v2 = vpop.xlane.xlu1 %828 }
 0xa23   :  { %v833_v4 = vmul.f32 0.03125, %v829_v2 }
 0xa25   :  { %v835_v5 = vadd.f32 1e-05, %v833_v4 }
 0xa26   :  { %v832_v6 = vpop.xlane.xlu0 %831 }
 0xa27   :  { %2085 = vrsqrt.f32 %v835_v5  ;;  %v834_v8 = vmul.f32 0.03125, %v832_v6 }
 0xa29   :  { %v836_v10 = vadd.f32 1e-05, %v834_v8 }
 0xa2b   :  { %2087 = vrsqrt.f32 %v836_v10 }
 0xa34   :  { %v2086_v13 = vpop.eup %2085 }
 0xa35   :  { %v839_v16 = vmul.f32 %v2086_v13, %v823_v52 }
 0xa37   :  { %v845_v26 = vmul.f32 %v844_v17, %v839_v16 }
 0xa38   :  { %v2088_v21 = vpop.eup %2087 }
 0xa39   :  { %v840_v22 = vmul.f32 %v2088_v21, %v824_v55  ;;  %v2587_v30 = vadd.f32 %v850_v28, %v845_v26 }
 0xa3b   :  { %v846_v29 = vmul.f32 %v844_v17, %v840_v22 }
 0xa3d   :  { %v2589_v45 = vadd.f32 %v850_v28, %v846_v29 }
 0xa3f   :  { %v853_v32 = vpack.c.bf16 %v2589_v45, %v2587_v30 }
 0xa41   :  { %1872 = vmatmul.mubr.msk.bf16.vlgmr.msra.gmra.mxu0 %vm174_vm2, %v853_v32 }
 0xb01   :  { %v912_v33 = vpop.f32.mrf.mxu0 }
 0xb02   :  { %v913_v25 = vadd.f32 %v912_v33, %v862_v35 }
 0xb03   :  { %v1873_v36 = vpop.f32.mrf.mxu0 }
 0xb05   :  { %v915_v37 = vpop.f32.mrf.mxu0 }
 0xb06   :  { %v916_v39 = vadd.f32 %v915_v37, %v862_v35 }
 0xb07   :  { %v1874_v40 = vpop.f32.mrf.mxu0 }
 0xb08   :  { %v2002_v42 = vpack.i.bf16 %v916_v39, %v913_v25  ;;  %v2599_v43 = vpack.c.bf16 %v916_v39, %v913_v25 }
 0xb0a   :  { %2003 = vrot.lane.b32.xlu0 %v2002_v42, %s2220_s15  ;;  %1998 = vrot.lane.b32.xlu1 %v2002_v42, %s2219_s29 }
 0xb0b   :  { %1883 = vmatprep.mubr.msk.bf16.mxu1 %vm255_vm3, %v2599_v43 }
 0xb0e   :  { %2008 = vrot.lane.b32.xlu1 %v2002_v42, %s2218_s1 }
 0xb7c   :  { %v2004_v44 = vpop.permute.xlu0 %2003  ;;  %v1999_v46 = vpop.permute.xlu1 %1998 }
 0xb7d   :  { %v2006_v24 = vunpack.i.h.bf16 %v2004_v44  ;;  %v2005_v41 = vunpack.i.l.bf16 %v2004_v44  ;;  %v2001_v47 = vunpack.i.h.bf16 %v1999_v46  ;;  %v2000_v48 = vunpack.i.l.bf16 %v1999_v46 }
 0xb7f   :  { %v941_v49 = vpack.c.bf16 %v2006_v24, %v2005_v41  ;;  %v942_v50 = vpack.c.bf16 %v2001_v47, %v2000_v48 }
 0xb80   :  { %v2009_v19 = vpop.permute.xlu1 %2008 }
 0xb81   :  { %v2011_v51 = vunpack.i.h.bf16 %v2009_v19  ;;  %v2010_v52 = vunpack.i.l.bf16 %v2009_v19  ;;  %951 = vrot.lane.b32.xlu0 %v941_v49, %s2221_s19  ;;  %953 = vrot.lane.b32.xlu1 %v942_v50, %s2221_s19 }
 0xb83   :  { %v2608_v20 = vpack.c.bf16 %v2011_v51, %v2010_v52 }
 0xb85   :  { %949 = vrot.lane.b32.xlu1 %v2608_v20, %s2221_s19  ;;  %947 = vrot.lane.b32.xlu0 %v2599_v43, %s2221_s19 }
 0xbf3   :  { %v954_v53 = vpop.permute.xlu1 %953  ;;  %v952_v55 = vpop.permute.xlu0 %951 }
 0xbf4   :  { %v977_v54 = vsel %vm255_vm3, %v954_v53, 0  ;;  %1947 = vmatprep.subr.msk.bf16.mxu1 %vm255_vm3, %v954_v53  ;;  %v974_v57 = vsel %vm255_vm3, %v952_v55, 0 }
 0xbf5   :  { %1876 = vmatpush3.bf16.xpose.msra.mxu1 %v977_v54 }
 0xbf6   :  { %1948 = vmatprep.subr.msk.bf16.mxu1 %vm255_vm3, %v952_v55 }
 0xbf7   :  { %v950_v59 = vpop.permute.xlu1 %949  ;;  %v948_v62 = vpop.permute.xlu0 %947 }
 0xbf8   :  { %v971_v60 = vsel %vm255_vm3, %v950_v59, 0  ;;  %v968_v63 = vsel %vm255_vm3, %v948_v62, 0 }
 0xbfd   :  { %1878 = vmatpush3.bf16.xpose.msra.mxu1 %v974_v57 }
 0xbfe   :  { %1949 = vmatprep.subr.msk.bf16.mxu1 %vm255_vm3, %v950_v59 }
 0xc05   :  { %1880 = vmatpush3.bf16.xpose.msra.mxu1 %v971_v60 }
 0xc06   :  { %1950 = vmatprep.subr.msk.bf16.mxu1 %vm255_vm3, %v948_v62 }
 0xc0d   :  { %1882 = vmatpush3.bf16.xpose.msra.mxu1 %v968_v63 }
 0xc0e   :  { %1923 = vmatprep.subr.bf16.mxu1 %v2216_v1 }
 0xc14   :  { %1884 = vmatmul.mubr.msk.bf16.vlgmr.msra.gmra.mxu1 %vm255_vm3, %v2608_v20 }
 0xc15   :  { %1887 = vmatprep.mubr.msk.bf16.mxu1 %vm255_vm3, %v941_v49 }
 0xc1c   :  { %1888 = vmatmul.mubr.msk.bf16.gmra.mxu1 %vm255_vm3, %v942_v50 }
 0xc1d   :  { %1931 = vmatprep.mubr.msk.bf16.mxu1 %vm2217_vm0, %v2216_v1 }
 0xcd4   :  { %v1885_v2 = vpop.f32.mrf.mxu1 }
 0xcd5   :  { %v1022_v21 = vadd.f32 %v1885_v2, %v2437_v0 }
 0xcd6   :  { %v1013_v4 = vpop.f32.mrf.mxu1 }
 0xcd7   :  { %v1014_v5 = vadd.f32 %v1013_v4, %v2419_v56 }
 0xcd8   :  { %v1886_v6 = vpop.f32.mrf.mxu1 }
 0xcd9   :  { %v1025_v8 = vadd.f32 %v1886_v6, %v2424_v58  ;;  %v1044_v10 = vsel %vm345_vm4, %v1014_v5, -inf  ;;  %v1050_v58 = vsel %vm345_vm4, %v1022_v21, -inf }
 0xcda   :  { %v1016_v13 = vpop.f32.mrf.mxu1  ;;  %1045 = vmax.xlane.f32.xlu1 %v1044_v10 }
 0xcdb   :  { %v1017_v16 = vadd.f32 %v1016_v13, %v2430_v61  ;;  %v1053_v26 = vsel %vm345_vm4, %v1025_v8, -inf }
 0xcdc   :  { %v1889_v17 = vpop.f32.mrf.mxu1 }
 0xcdd   :  { %v1047_v22 = vsel %vm345_vm4, %v1017_v16, -inf  ;;  %v1038_v61 = vadd.f32 %v1889_v17, %v2458_v14 }
 0xcde   :  { %v1029_v28 = vpop.f32.mrf.mxu1  ;;  %1048 = vmax.xlane.f32.xlu0 %v1047_v22  ;;  %1054 = vmax.xlane.f32.xlu1 %v1053_v26 }
 0xcdf   :  { %v1030_v29 = vadd.f32 %v1029_v28, %v2446_v9  ;;  %v1062_v37 = vsel %vm345_vm4, %v1038_v61, -inf }
 0xce0   :  { %v1890_v56 = vpop.f32.mrf.mxu1 }
 0xce1   :  { %v1041_v0 = vadd.f32 %v1890_v56, %v2463_v15  ;;  %v1056_v35 = vsel %vm345_vm4, %v1030_v29, -inf }
 0xce2   :  { %v1032_v32 = vpop.f32.mrf.mxu1  ;;  %1051 = vmax.xlane.f32.xlu0 %v1050_v58 }
 0xce3   :  { %v1033_v33 = vadd.f32 %v1032_v32, %v2451_v11  ;;  %v1065_v9 = vsel %vm345_vm4, %v1041_v0, -inf }
 0xce5   :  { %v1059_v36 = vsel %vm345_vm4, %v1033_v33, -inf }
 0xce6   :  { %1057 = vmax.xlane.f32.xlu0 %v1056_v35  ;;  %1060 = vmax.xlane.f32.xlu1 %v1059_v36 }
 0xcea   :  { %1063 = vmax.xlane.f32.xlu0 %v1062_v37  ;;  %1066 = vmax.xlane.f32.xlu1 %v1065_v9 }
 0xcfb   :  { %1140 = vrot.lane.b32.xlu1 %v941_v49, %s2211_s0 }
 0xd00   :  { %1142 = vrot.lane.b32.xlu0 %v942_v50, %s2211_s0 }
 0xd63   :  { %v1046_v11 = vpop.xlane.xlu1 %1045 }
 0xd64   :  { %v1068_v40 = vsub.f32 %v1014_v5, %v1046_v11 }
 0xd66   :  { %v1076_v41 = vmul.f32 1.442695, %v1068_v40 }
 0xd67   :  { %v1049_v14 = vpop.xlane.xlu0 %1048  ;;  %v1055_v25 = vpop.xlane.xlu1 %1054 }
 0xd68   :  { %v1069_v15 = vsub.f32 %v1017_v16, %v1049_v14  ;;  %v1071_v39 = vsub.f32 %v1025_v8, %v1055_v25 }
 0xd6a   :  { %v1082_v42 = vmul.f32 1.442695, %v1071_v39  ;;  %v1078_v44 = vmul.f32 1.442695, %v1069_v15 }
 0xd6b   :  { %v1052_v46 = vpop.xlane.xlu0 %1051 }
 0xd6c   :  { %v1070_v24 = vsub.f32 %v1022_v21, %v1052_v46  ;;  %2089 = vpow2.f32 %v1082_v42 }
 0xd6d   :  { %2091 = vpow2.f32 %v1078_v44 }
 0xd6e   :  { %v1080_v47 = vmul.f32 1.442695, %v1070_v24 }
 0xd6f   :  { %v1058_v48 = vpop.xlane.xlu0 %1057  ;;  %v1061_v19 = vpop.xlane.xlu1 %1060 }
 0xd70   :  { %2093 = vpow2.f32 %v1080_v47  ;;  %v1072_v49 = vsub.f32 %v1030_v29, %v1058_v48  ;;  %v1073_v50 = vsub.f32 %v1033_v33, %v1061_v19 }
 0xd71   :  { %2095 = vpow2.f32 %v1076_v41 }
 0xd72   :  { %v1084_v55 = vmul.f32 1.442695, %v1072_v49  ;;  %v1086_v60 = vmul.f32 1.442695, %v1073_v50 }
 0xd73   :  { %v1064_v51 = vpop.xlane.xlu0 %1063  ;;  %v1067_v52 = vpop.xlane.xlu1 %1066 }
 0xd74   :  { %v1074_v53 = vsub.f32 %v1038_v61, %v1064_v51  ;;  %v1075_v54 = vsub.f32 %v1041_v0, %v1067_v52 }
 0xd76   :  { %v1088_v57 = vmul.f32 1.442695, %v1074_v53  ;;  %v1090_v59 = vmul.f32 1.442695, %v1075_v54 }
 0xd77   :  { %v1143_v62 = vpop.permute.xlu0 %1142  ;;  %v1141_v63 = vpop.permute.xlu1 %1140 }
 0xd78   :  { %2097 = vpow2.f32 %v1088_v57  ;;  %1891 = vmatprep.subr.bf16.mxu0 %v1143_v62 }
 0xd79   :  { %2099 = vpow2.f32 %v1090_v59  ;;  %1892 = vmatpush3.bf16.msra.mxu0 %v1143_v62  ;;  %v2090_v2 = vpop.eup %2089 }
 0xd7a   :  { %2101 = vpow2.f32 %v1084_v55  ;;  %1893 = vmatprep.subr.bf16.mxu0 %v1141_v63  ;;  %v1101_v4 = vsel %vm345_vm4, %v2090_v2, 0.0  ;;  %v2092_v5 = vpop.eup %2091  ;;  %v2039_v55 = vld [vmem:[%s2756_s4 + $0x18] sm:$0xff]  }
 0xd7b   :  { %2103 = vpow2.f32 %v1086_v60  ;;  %1102 = vadd.xlane.f32.xlu1 %v1101_v4  ;;  %v1095_v13 = vsel %vm345_vm4, %v2092_v5, 0.0  ;;  %v2040_v60 = vld [vmem:[%s2756_s4 + $0x10] sm:$0xff]  }
 0xd7d   :  { %v2094_v6 = vpop.eup %2093  ;;  %1894 = vmatpush3.bf16.msra.mxu0 %v1141_v63 }
 0xd7e   :  { %v1098_v8 = vsel %vm345_vm4, %v2094_v6, 0.0  ;;  %v2096_v10 = vpop.eup %2095 }
 0xd7f   :  { %1099 = vadd.xlane.f32.xlu0 %v1098_v8  ;;  %1096 = vadd.xlane.f32.xlu1 %v1095_v13  ;;  %v1092_v16 = vsel %vm345_vm4, %v2096_v10, 0.0 }
 0xd83   :  { %1093 = vadd.xlane.f32.xlu0 %v1092_v16 }
 0xd85   :  { %v2098_v17 = vpop.eup %2097 }
 0xd86   :  { %v2100_v21 = vpop.eup %2099  ;;  %v1110_v22 = vsel %vm345_vm4, %v2098_v17, 0.0 }
 0xd87   :  { %v2102_v26 = vpop.eup %2101  ;;  %1111 = vadd.xlane.f32.xlu0 %v1110_v22  ;;  %v1113_v28 = vsel %vm345_vm4, %v2100_v21, 0.0 }
 0xd88   :  { %v2104_v56 = vpop.eup %2103  ;;  %1114 = vadd.xlane.f32.xlu1 %v1113_v28  ;;  %v1104_v29 = vsel %vm345_vm4, %v2102_v26, 0.0 }
 0xd89   :  { %v1107_v58 = vsel %vm345_vm4, %v2104_v56, 0.0 }
 0xd8b   :  { %1105 = vadd.xlane.f32.xlu0 %v1104_v29 }
 0xd8c   :  { %1108 = vadd.xlane.f32.xlu1 %v1107_v58 }
 0xd9d   :  { %1138 = vrot.lane.b32.xlu1 %v2608_v20, %s2211_s0 }
 0xda1   :  { %1136 = vrot.lane.b32.xlu0 %v2599_v43, %s2211_s0 }
 0xe04   :  { %v1103_v32 = vpop.xlane.xlu1 %1102 }
 0xe08   :  { %v1100_v33 = vpop.xlane.xlu0 %1099  ;;  %v1097_v61 = vpop.xlane.xlu1 %1096 }
 0xe09   :  { %2105 = vrcp.f32 %v1097_v61 }
 0xe0a   :  { %2107 = vrcp.f32 %v1100_v33 }
 0xe0c   :  { %v1094_v0 = vpop.xlane.xlu0 %1093 }
 0xe0d   :  { %2109 = vrcp.f32 %v1094_v0 }
 0xe0e   :  { %2111 = vrcp.f32 %v1103_v32 }
 0xe10   :  { %v1112_v35 = vpop.xlane.xlu0 %1111 }
 0xe11   :  { %v1115_v36 = vpop.xlane.xlu1 %1114  ;;  %2113 = vrcp.f32 %v1112_v35 }
 0xe12   :  { %2115 = vrcp.f32 %v1115_v36 }
 0xe14   :  { %v1106_v37 = vpop.xlane.xlu0 %1105 }
 0xe15   :  { %2117 = vrcp.f32 %v1106_v37  ;;  %v1109_v9 = vpop.xlane.xlu1 %1108 }
 0xe16   :  { %2119 = vrcp.f32 %v1109_v9  ;;  %v2106_v20 = vpop.eup %2105  ;;  %v1264_v9 = vrot.slane %v2594_v34, %v566_v31 }
 0xe17   :  { %v2108_v11 = vpop.eup %2107  ;;  %v1125_v40 = vmul.f32 %v2106_v20, %v2092_v5 }
 0xe18   :  { %v1137_v15 = vpop.permute.xlu0 %1136  ;;  %v1126_v42 = vmul.f32 %v2108_v11, %v2094_v6 }
 0xe19   :  { %v1139_v14 = vpop.permute.xlu1 %1138 }
 0xe1a   :  { %v2110_v43 = vpop.eup %2109  ;;  %1895 = vmatprep.subr.bf16.mxu0 %v1139_v14 }
 0xe1b   :  { %v2112_v25 = vpop.eup %2111  ;;  %1896 = vmatpush3.bf16.msra.mxu0 %v1139_v14  ;;  %v1124_v39 = vmul.f32 %v2110_v43, %v2096_v10 }
 0xe1c   :  { %1897 = vmatprep.subr.bf16.mxu0 %v1137_v15  ;;  %v1127_v46 = vmul.f32 %v2112_v25, %v2090_v2 }
 0xe1d   :  { %v1132_v44 = vpack.c.bf16 %v1125_v40, %v1124_v39 }
 0xe1e   :  { %v2114_v24 = vpop.eup %2113  ;;  %v1133_v41 = vpack.c.bf16 %v1127_v46, %v1126_v42 }
 0xe1f   :  { %1898 = vmatpush3.bf16.msra.mxu0 %v1137_v15  ;;  %1899 = vmatprep.mubr.msk.bf16.mxu0 %vm345_vm4, %v1132_v44  ;;  %v2116_v47 = vpop.eup %2115  ;;  %v1130_v51 = vmul.f32 %v2114_v24, %v2098_v17 }
 0xe20   :  { %1907 = vmatprep.subr.bf16.mxu0 %v2216_v1  ;;  %v1131_v52 = vmul.f32 %v2116_v47, %v2100_v21 }
 0xe22   :  { %v2118_v48 = vpop.eup %2117  ;;  %1900 = vmatmul.mubr.msk.bf16.vlgmr.msra.gmra.mxu0 %vm345_vm4, %v1133_v41  ;;  %v1135_v54 = vpack.c.bf16 %v1131_v52, %v1130_v51  ;;  %v2042_v51 = vld [vmem:[%s2757_s5 + $0x10] sm:$0xff]   ;;  %v2043_v52 = vld [vmem:[%s2758_s6 + $0x38] sm:$0xff]  }
 0xe23   :  { %v2120_v19 = vpop.eup %2119  ;;  %v1128_v49 = vmul.f32 %v2118_v48, %v2102_v26  ;;  %1908 = vmatpush3.bf16.msra.mxu0 %v2039_v55  ;;  %1924 = vmatpush3.bf16.msra.mxu1 %v2043_v52 }
 0xe24   :  { %v1129_v50 = vmul.f32 %v2120_v19, %v2104_v56  ;;  %1909 = vmatprep.subr.bf16.mxu0 %v2216_v1  ;;  %1925 = vmatprep.subr.bf16.mxu1 %v2216_v1 }
 0xe26   :  { %v1134_v53 = vpack.c.bf16 %v1129_v50, %v1128_v49 }
 0xe27   :  { %1910 = vmatpush3.bf16.msra.mxu0 %v2040_v60 }
 0xe28   :  { %1903 = vmatprep.mubr.msk.bf16.mxu0 %vm345_vm4, %v1134_v53  ;;  %1915 = vmatprep.subr.bf16.mxu0 %v2216_v1  ;;  %v2044_v53 = vld [vmem:[%s2758_s6 + $0x30] sm:$0xff]  }
 0xe29   :  { %1926 = vmatpush3.bf16.msra.mxu1 %v2044_v53 }
 0xe2a   :  { %1904 = vmatmul.mubr.msk.bf16.gmra.mxu0 %vm345_vm4, %v1135_v54  ;;  %1927 = vmatprep.subr.bf16.mxu1 %v2216_v1 }
 0xe2b   :  { %1911 = vmatprep.mubr.msk.bf16.mxu0 %vm2217_vm0, %v2216_v1 }
 0xee2   :  { %v1901_v57 = vpop.f32.mrf.mxu0 }
 0xee4   :  { %v1194_v59 = vpop.f32.mrf.mxu0 }
 0xee6   :  { %v1902_v62 = vpop.f32.mrf.mxu0 }
 0xee7   :  { %v2012_v63 = vpack.i.bf16 %v1902_v62, %v1901_v57 }
 0xee8   :  { %v1197_v2 = vpop.f32.mrf.mxu0 }
 0xee9   :  { %2013 = vrot.lane.b32.xlu1 %v2012_v63, %s2215_s24 }
 0xeea   :  { %v1905_v4 = vpop.f32.mrf.mxu0 }
 0xeec   :  { %v1210_v5 = vpop.f32.mrf.mxu0 }
 0xeee   :  { %v1906_v6 = vpop.f32.mrf.mxu0 }
 0xeef   :  { %v2022_v8 = vpack.i.bf16 %v1906_v6, %v1905_v4  ;;  %v1352_v4 = vrot.slane %v2594_v34, %v655_v3  ;;  %v2045_v3 = vld [vmem:[%s2758_s6 + $0x28] sm:$0xff]  }
 0xef0   :  { %v1213_v10 = vpop.f32.mrf.mxu0  ;;  %1928 = vmatpush3.bf16.msra.mxu1 %v2045_v3 }
 0xef1   :  { %v2017_v13 = vpack.i.bf16 %v1213_v10, %v1210_v5  ;;  %2023 = vrot.lane.b32.xlu1 %v2022_v8, %s2222_s11  ;;  %v1358_v10 = vrot.slane %v2594_v34, %v661_v7  ;;  %1929 = vmatprep.subr.bf16.mxu1 %v2216_v1  ;;  %v2046_v7 = vld [vmem:[%s2758_s6 + $0x20] sm:$0xff]   ;;  %s2224_s6 = smov [#allocation10]  }
 0xef2   :  { %s1623_s28 = sshll.u32 %s2224_s6, 4  ;;  %s1624_s28 = int_to_ptr.vmem [resolvable:$true] %s1623_s28 }
 0xef3   :  { %2018 = vrot.lane.b32.xlu0 %v2017_v13, %s2223_s22  ;;  %s2181_s13 = scalar_lea.vmem %s1624_s28, 256  ;;  %p2186_p2 = scmp.lt.s32.totalorder %s1624_s28, %s1624_s28 }
 0xef4   :  { %1930 = vmatpush3.bf16.msra.mxu1 %v2046_v7  ;;  %p2182_p1 = scmp.ne.s32.totalorder %s1624_s28, %s2181_s13  ;;  %p2187_p3 = scmp.lt.s32.totalorder %s2181_s13, %s2181_s13 }
 0xef6   :  { %p2188_p4 = por %p2187_p3, %p2186_p2 }
 0xef8   :  { %p2189_p5 = pnand %p2188_p4, %p2182_p1 }
 0xf5b   :  { %v2014_v16 = vpop.permute.xlu1 %2013 }
 0xf5c   :  { %v2016_v17 = vunpack.i.h.bf16 %v2014_v16  ;;  %v2015_v21 = vunpack.i.l.bf16 %v2014_v16 }
 0xf5e   :  { %v1249_v29 = vsel %vm255_vm3, %v1194_v59, %v2015_v21  ;;  %v1250_v58 = vsel %vm255_vm3, %v1197_v2, %v2016_v17 }
 0xf63   :  { %v2024_v22 = vpop.permute.xlu1 %2023 }
 0xf64   :  { %v2026_v32 = vunpack.i.h.bf16 %v2024_v22  ;;  %v2025_v33 = vunpack.i.l.bf16 %v2024_v22  ;;  %v1370_v22 = vrot.slane %v2594_v34, %v672_v27 }
 0xf65   :  { %v2019_v26 = vpop.permute.xlu0 %2018 }
 0xf66   :  { %v2021_v28 = vunpack.i.h.bf16 %v2019_v26  ;;  %v2020_v56 = vunpack.i.l.bf16 %v2019_v26 }
 0xf68   :  { %v1252_v61 = vsel %vm553_vm5, %v1250_v58, %v2021_v28  ;;  %v1251_v0 = vsel %vm553_vm5, %v1249_v29, %v2020_v56 }
 0xf69   :  { %v1254_v35 = vsel %vm556_vm6, %v1252_v61, %v2026_v32  ;;  %v1253_v36 = vsel %vm556_vm6, %v1251_v0, %v2025_v33 }
 0xf6a   :  { %v1255_v37 = vpack.c.bf16 %v1254_v35, %v1253_v36  ;;  %v1442_v35 = vrot.slane %v2594_v34, %v743_v38 }
 0xf6c   :  { %1912 = vmatmul.mubr.msk.bf16.vlgmr.msra.gmra.mxu0 %vm174_vm2, %v1255_v37 }
 0xf6d   :  { %1919 = vmatprep.mubr.msk.bf16.mxu0 %vm2217_vm0, %v2216_v1 }
0x102c   :  { %v1314_v20 = vpop.f32.mrf.mxu0 }
0x102d   :  { %v1315_v11 = vadd.f32 %v1314_v20, %v1264_v9 }
0x102e   :  { %v1913_v14 = vpop.f32.mrf.mxu0 }
0x102f   :  { %v1321_v43 = vadd.f32 %v1315_v11, %v2587_v30 }
0x1030   :  { %v1317_v25 = vpop.f32.mrf.mxu0 }
0x1031   :  { %v1318_v15 = vadd.f32 %v1317_v25, %v1264_v9  ;;  %v1323_v39 = vsel %vm174_vm2, %v1321_v43, 0.0 }
0x1032   :  { %1324 = vadd.xlane.f32.xlu0 %v1323_v39  ;;  %v1914_v40 = vpop.f32.mrf.mxu0 }
0x1033   :  { %v1322_v42 = vadd.f32 %v1318_v15, %v2589_v45  ;;  %v2041_v45 = vld [vmem:[%s2757_s5 + $0x18] sm:$0xff]  }
0x1034   :  { %1916 = vmatpush3.bf16.msra.mxu0 %v2041_v45 }
0x1035   :  { %v1326_v44 = vsel %vm174_vm2, %v1322_v42, 0.0  ;;  %1917 = vmatprep.subr.bf16.mxu0 %v2216_v1 }
0x1036   :  { %1327 = vadd.xlane.f32.xlu1 %v1326_v44 }
0x1038   :  { %1918 = vmatpush3.bf16.msra.mxu0 %v2042_v51 }
0x1039   :  { %1935 = vmatprep.subr.bf16.mxu0 %v2216_v1 }
0x10bb   :  { %v1325_v46 = vpop.xlane.xlu0 %1324 }
0x10bc   :  { %v1329_v24 = vmul.f32 0.03125, %v1325_v46 }
0x10be   :  { %v1331_v41 = vsub.f32 %v1321_v43, %v1329_v24 }
0x10bf   :  { %v1328_v31 = vpop.xlane.xlu1 %1327 }
0x10c0   :  { %v1330_v47 = vmul.f32 0.03125, %v1328_v31  ;;  %v1333_v48 = vmul.f32 %v1331_v41, %v1331_v41 }
0x10c2   :  { %v1332_v19 = vsub.f32 %v1322_v42, %v1330_v47  ;;  %v1335_v30 = vsel %vm174_vm2, %v1333_v48, 0.0  ;;  %v2047_v48 = vld [vmem:[#allocation7 + $0x8] sm:$0xff]  }
0x10c3   :  { %1336 = vadd.xlane.f32.xlu0 %v1335_v30 }
0x10c4   :  { %v1334_v49 = vmul.f32 %v1332_v19, %v1332_v19 }
0x10c6   :  { %v1338_v50 = vsel %vm174_vm2, %v1334_v49, 0.0 }
0x10c7   :  { %1339 = vadd.xlane.f32.xlu0 %v1338_v50 }
0x114c   :  { %v1337_v54 = vpop.xlane.xlu0 %1336 }
0x114d   :  { %v1341_v55 = vmul.f32 0.03125, %v1337_v54 }
0x114f   :  { %v1343_v57 = vadd.f32 1e-05, %v1341_v55  ;;  %v1542_v55 = vrot.slane %v2594_v34, %v843_v12 }
0x1150   :  { %v1340_v59 = vpop.xlane.xlu0 %1339 }
0x1151   :  { %2121 = vrsqrt.f32 %v1343_v57  ;;  %v1342_v60 = vmul.f32 0.03125, %v1340_v59 }
0x1153   :  { %v1344_v62 = vadd.f32 1e-05, %v1342_v60 }
0x1155   :  { %2123 = vrsqrt.f32 %v1344_v62 }
0x115e   :  { %v2122_v63 = vpop.eup %2121 }
0x115f   :  { %v1347_v2 = vmul.f32 %v2122_v63, %v1331_v41 }
0x1161   :  { %v1353_v8 = vmul.f32 %v1352_v4, %v1347_v2 }
0x1162   :  { %v2124_v5 = vpop.eup %2123 }
0x1163   :  { %v1348_v6 = vmul.f32 %v2124_v5, %v1332_v19  ;;  %v1359_v16 = vadd.f32 %v1358_v10, %v1353_v8  ;;  %v2048_v19 = vld [vmem:[#allocation7] sm:$0xff]  }
0x1164   :  { %v1732_v5 = vld [vmem:[#allocation8 + $0x10] ss:$0 sm:$0xff] }
0x1165   :  { %v1354_v13 = vmul.f32 %v1352_v4, %v1348_v6 }
0x1167   :  { %v1360_v17 = vadd.f32 %v1358_v10, %v1354_v13 }
0x1169   :  { %v1361_v21 = vpack.c.bf16 %v1360_v17, %v1359_v16 }
0x116b   :  { %1920 = vmatmul.mubr.msk.bf16.vlgmr.msra.gmra.mxu0 %vm174_vm2, %v1361_v21 }
0x116c   :  { %1939 = vmatprep.mubr.msk.bf16.mxu0 %vm2217_vm0, %v2216_v1  ;;  %1936 = vmatpush3.bf16.msra.mxu0 %v2047_v48 }
0x116d   :  { %1937 = vmatprep.subr.bf16.mxu0 %v2216_v1  ;;  %v1548_v1 = vrot.slane %v2594_v34, %v849_v18 }
0x1170   :  { %1938 = vmatpush3.bf16.msra.mxu0 %v2048_v19 }
0x122b   :  { %v1420_v26 = vpop.f32.mrf.mxu0 }
0x122c   :  { %v1421_v56 = vadd.f32 %v1420_v26, %v1370_v22 }
0x122d   :  { %v1921_v28 = vpop.f32.mrf.mxu0 }
0x122e   :  { %v1427_v33 = vmax.f32 %v1421_v56, 0.0 }
0x122f   :  { %v1423_v29 = vpop.f32.mrf.mxu0 }
0x1230   :  { %v1424_v58 = vadd.f32 %v1423_v29, %v1370_v22 }
0x1231   :  { %v1922_v32 = vpop.f32.mrf.mxu0 }
0x1232   :  { %v1428_v61 = vmax.f32 %v1424_v58, 0.0 }
0x1234   :  { %v1429_v0 = vpack.c.bf16 %v1428_v61, %v1427_v33 }
0x1236   :  { %1932 = vmatmul.mubr.msk.bf16.vlgmr.msra.gmra.mxu1 %vm345_vm4, %v1429_v0 }
0x12f6   :  { %v1504_v36 = vpop.f32.mrf.mxu1 }
0x12f7   :  { %v1505_v37 = vadd.f32 %v1504_v36, %v1442_v35 }
0x12f8   :  { %v1933_v9 = vpop.f32.mrf.mxu1 }
0x12f9   :  { %v1511_v20 = vadd.f32 %v1505_v37, %v1359_v16 }
0x12fa   :  { %v1507_v27 = vpop.f32.mrf.mxu1 }
0x12fb   :  { %v1508_v11 = vadd.f32 %v1507_v27, %v1442_v35  ;;  %v1513_v14 = vsel %vm174_vm2, %v1511_v20, 0.0 }
0x12fc   :  { %1514 = vadd.xlane.f32.xlu1 %v1513_v14  ;;  %v1934_v43 = vpop.f32.mrf.mxu1 }
0x12fd   :  { %v1512_v25 = vadd.f32 %v1508_v11, %v1360_v17 }
0x12ff   :  { %v1516_v15 = vsel %vm174_vm2, %v1512_v25, 0.0 }
0x1300   :  { %1517 = vadd.xlane.f32.xlu0 %v1516_v15 }
0x1385   :  { %v1515_v39 = vpop.xlane.xlu1 %1514 }
0x1386   :  { %v1519_v40 = vmul.f32 0.03125, %v1515_v39 }
0x1388   :  { %v1521_v42 = vsub.f32 %v1511_v20, %v1519_v40 }
0x1389   :  { %v1518_v44 = vpop.xlane.xlu0 %1517 }
0x138a   :  { %v1520_v46 = vmul.f32 0.03125, %v1518_v44  ;;  %v1523_v38 = vmul.f32 %v1521_v42, %v1521_v42 }
0x138c   :  { %v1522_v24 = vsub.f32 %v1512_v25, %v1520_v46  ;;  %v1525_v41 = vsel %vm174_vm2, %v1523_v38, 0.0 }
0x138d   :  { %1526 = vadd.xlane.f32.xlu1 %v1525_v41 }
0x138e   :  { %v1524_v31 = vmul.f32 %v1522_v24, %v1522_v24 }
0x1390   :  { %v1528_v47 = vsel %vm174_vm2, %v1524_v31, 0.0 }
0x1391   :  { %1529 = vadd.xlane.f32.xlu0 %v1528_v47 }
0x1416   :  { %v1527_v30 = vpop.xlane.xlu1 %1526 }
0x1417   :  { %v1531_v49 = vmul.f32 0.03125, %v1527_v30 }
0x1419   :  { %v1533_v50 = vadd.f32 1e-05, %v1531_v49 }
0x141a   :  { %v1530_v45 = vpop.xlane.xlu0 %1529 }
0x141b   :  { %2125 = vrsqrt.f32 %v1533_v50  ;;  %v1532_v51 = vmul.f32 0.03125, %v1530_v45 }
0x141d   :  { %v1534_v52 = vadd.f32 1e-05, %v1532_v51 }
0x141f   :  { %2127 = vrsqrt.f32 %v1534_v52 }
0x1428   :  { %v2126_v53 = vpop.eup %2125 }
0x1429   :  { %v1537_v54 = vmul.f32 %v2126_v53, %v1521_v42 }
0x142b   :  { %v1543_v60 = vmul.f32 %v1542_v55, %v1537_v54 }
0x142c   :  { %v2128_v57 = vpop.eup %2127 }
0x142d   :  { %v1538_v59 = vmul.f32 %v2128_v57, %v1522_v24  ;;  %v1549_v63 = vadd.f32 %v1548_v1, %v1543_v60 }
0x142f   :  { %v1544_v62 = vmul.f32 %v1542_v55, %v1538_v59 }
0x1431   :  { %v1550_v2 = vadd.f32 %v1548_v1, %v1544_v62 }
0x1433   :  { %v1551_v4 = vpack.c.bf16 %v1550_v2, %v1549_v63 }
0x1435   :  { %1940 = vmatmul.mubr.msk.bf16.vlgmr.msra.gmra.mxu0 %vm174_vm2, %v1551_v4 }
0x14f5   :  { %v1609_v6 = vpop.f32.mrf.mxu0 }
0x14f6   :  { %v1610_v8 = vadd.f32 %v1732_v5, %v1609_v6 }
0x14f7   :  { %v1941_v10 = vpop.f32.mrf.mxu0 }
0x14f8   :  { %1616 = vst [vmem:[#allocation10] sm:$0xff] %v1610_v8 }
0x14f9   :  { %v1612_v12 = vpop.f32.mrf.mxu0 }
0x14fa   :  { %v1613_v13 = vadd.f32 %v1732_v5, %v1612_v12 }
0x14fb   :  { %v1942_v16 = vpop.f32.mrf.mxu0 }
0x14fc   :  { %1617 = vst [vmem:[#allocation10 + $0x8] sm:$0xff] %v1613_v13 }
0x14fd   :  { %2192 = shalt.err (!%p2189_p5)
}
0x14fe   :  { %1629 = dma.vmem_to_hbm [thread:$0]  %s1624_s28, 256, %s2761_s9, [#allocation5], %s2214_s23, %s2214_s23, %s2215_s24  }
0x14ff   :  { %2207 = dma.done.wait [#allocation5], 256  }
0x1500   :  { %2208 = vsyncadd [#allocation5], 4294967040 }
0x1501   :  { %1633 = vsyncpa [#allocation4], 1 }
0x1502   :  { %1634 = vsyncpa [#allocation9], 1 }
0x1503   :  { %1635 = vsyncpa [#allocation5], 1 }
0x1504   :  { %1636 = vsyncpa [#allocation6], 1 }

</bundles_post_ra>
